<compile_context>
chip_gen: v7x
topology: tpu7x:2x2x1
jax: 0.10.0
libtpu: 0.0.40
codegen_flags: <defaults>
</compile_context>

<pallas_src>
import functools
import math

import jax
import jax.numpy as jnp
from jax.experimental import pallas as pl
from jax.experimental.pallas import tpu as pltpu


# ---------------------------------------------------------------------------
# Kernel: the whole decoder stack.  Grid axis = decoder layer (sequential);
# the decoder activation is carried across layer steps in a VMEM scratch.
# ---------------------------------------------------------------------------
def decoder_stack_kernel(
        ids_ref,                                   # (B, S) int32   [SMEM scalar prefetch]
        emb_ref, pos_ref, enc_ref,                 # (V,E), (S,E), (B*S,E) f32
        wq_ref, bq_ref,                            # (1,E,E) bf16 / (1,1,E) f32
        wkv_ref, bkv_ref,                          # (1,E,2E) bf16 / (1,1,2E) f32
        wo_ref, bo_ref,                            # (1,E,E) bf16 / (1,1,E) f32
        w1_ref, b1_ref,                            # (1,E,4E) bf16 / (1,1,4E) f32
        w2_ref, b2_ref,                            # (1,4E,E) bf16 / (1,1,E) f32
        noise_ref,                                 # (1,B*S,E) f32 per-layer N(0,1)
        out_ref,                                   # (B*S, E) f32
        dec_ref,                                   # scratch VMEM (B*S, E) f32
        *, num_heads, batch, seq):
    layer = pl.program_id(0)
    n_layers = pl.num_programs(0)
    emb_size = emb_ref.shape[1]
    head_dim = emb_size // num_heads
    n_rows = batch * seq

    # -- layer 0: dec = Embedding(x) * sqrt(E) + positional encoding ---------
    # (row 0 of the embedding table is pre-zeroed in the wrapper: zero_pad=True)
    @pl.when(layer == 0)
    def _embed():
        scale = jnp.float32(math.sqrt(emb_size))
        for b in range(batch):
            for s in range(seq):
                tok = ids_ref[b, s]
                row = emb_ref[pl.ds(tok, 1), :] * scale + pos_ref[pl.ds(s, 1), :]
                dec_ref[pl.ds(b * seq + s, 1), :] = row

    x = dec_ref[...]                               # (N, E) queries / residual base
    enc = enc_ref[...]                             # (N, E) keys / values source

    def mm(a, w):                                  # bf16 MXU inputs, f32 accumulation
        return jnp.dot(a.astype(jnp.bfloat16), w.astype(jnp.bfloat16),
                       preferred_element_type=jnp.float32)

    # -- fused projections over all batch*seq rows (one wide MXU tile each) --
    q = mm(x, wq_ref[0]) + bq_ref[0]               # (N, E)
    q = q * jnp.float32(1.0 / math.sqrt(head_dim)) # fold softmax scale into Q once
    kv = mm(enc, wkv_ref[0]) + bkv_ref[0]          # (N, 2E): fused K|V projection
    k = kv[:, :emb_size]
    v = kv[:, emb_size:]

    # -- multi-head attention: heads batched on the leading einsum axis ------
    def to_heads(t):                               # (N, E) -> (B*H, S, dh)
        t = t.reshape(batch, seq, num_heads, head_dim)
        return jnp.swapaxes(t, 1, 2).reshape(batch * num_heads, seq, head_dim)

    qh = to_heads(q).astype(jnp.bfloat16)
    kh = to_heads(k).astype(jnp.bfloat16)
    vh = to_heads(v).astype(jnp.bfloat16)

    scores = jnp.einsum("nqd,nkd->nqk", qh, kh,
                        preferred_element_type=jnp.float32)      # (B*H, S, S) f32
    scores = scores - jnp.max(scores, axis=-1, keepdims=True)
    probs = jnp.exp(scores)
    inv_denom = 1.0 / jnp.sum(probs, axis=-1, keepdims=True)
    probs = probs * inv_denom                      # one reciprocal per row

    ctx = jnp.einsum("nqk,nkd->nqd", probs.astype(jnp.bfloat16), vh,
                     preferred_element_type=jnp.float32)         # (B*H, S, dh)
    ctx = jnp.swapaxes(ctx.reshape(batch, num_heads, seq, head_dim), 1, 2)
    ctx = ctx.reshape(n_rows, emb_size)

    # TODO(synk): Multihead_attention body not given; output projection +
    # residual with the queries, no mask (causality=False), no LayerNorm.
    attn = mm(ctx, wo_ref[0]) + bo_ref[0] + x

    # -- feed-forward: relu(x W1 + b1) W2 + b2 + x ---------------------------
    h1 = jnp.maximum(mm(attn, w1_ref[0]) + b1_ref[0], 0.0)
    y = mm(h1, w2_ref[0]) + b2_ref[0] + attn

    # -- torch.normal(y): add pre-sampled unit-variance Gaussian noise -------
    y = y + noise_ref[0]

    dec_ref[...] = y                               # carry to the next layer

    @pl.when(layer == n_layers - 1)
    def _store():
        out_ref[...] = y


# ---------------------------------------------------------------------------
# Parameters / tables
# ---------------------------------------------------------------------------
def sinusoidal_table(seq, emb_size):
    # TODO(synk): Posting_embedding body not given; sinusoidal positions
    # (zero_pad=False, scale=False) are assumed.
    pos = jnp.arange(seq, dtype=jnp.float32)[:, None]
    idx = jnp.arange(emb_size, dtype=jnp.float32)[None, :]
    angle = pos / jnp.power(10000.0, 2.0 * jnp.floor(idx / 2.0) / emb_size)
    even = (jnp.arange(emb_size) % 2 == 0)[None, :]
    return jnp.where(even, jnp.sin(angle), jnp.cos(angle)).astype(jnp.float32)


def init_params(key, num_decoders, vocab, emb_size):
    """Shapes mirror the PyTorch module; linear weights pre-transposed to (in, out)."""
    hidden = 4 * emb_size
    key, k_emb = jax.random.split(key)
    emb = jax.random.normal(k_emb, (vocab, emb_size), jnp.float32)
    emb = emb.at[0].set(0.0)                       # zero_pad=True

    def lin(kw, kb, fan_in, fan_out):
        bound = 1.0 / math.sqrt(fan_in)
        w = jax.random.uniform(kw, (fan_in, fan_out), jnp.float32, -bound, bound)
        b = jax.random.uniform(kb, (1, fan_out), jnp.float32, -bound, bound)
        return w, b

    names = ["wq", "bq", "wkv", "bkv", "wo", "bo", "w1", "b1", "w2", "b2"]
    layers = {n: [] for n in names}
    for _ in range(num_decoders):
        key, *ks = jax.random.split(key, 13)
        wq, bq = lin(ks[0], ks[1], emb_size, emb_size)
        wk, bk = lin(ks[2], ks[3], emb_size, emb_size)
        wv, bv = lin(ks[4], ks[5], emb_size, emb_size)
        wo, bo = lin(ks[6], ks[7], emb_size, emb_size)
        w1, b1 = lin(ks[8], ks[9], emb_size, hidden)      # liner1
        w2, b2 = lin(ks[10], ks[11], hidden, emb_size)    # liner2
        layers["wq"].append(wq);  layers["bq"].append(bq)
        layers["wkv"].append(jnp.concatenate([wk, wv], axis=1))
        layers["bkv"].append(jnp.concatenate([bk, bv], axis=1))
        layers["wo"].append(wo);  layers["bo"].append(bo)
        layers["w1"].append(w1);  layers["b1"].append(b1)
        layers["w2"].append(w2);  layers["b2"].append(b2)

    params = {n: jnp.stack(v) for n, v in layers.items()}
    for n in ("wq", "wkv", "wo", "w1", "w2"):      # bf16 weights for bf16 MXU inputs
        params[n] = params[n].astype(jnp.bfloat16)
    params["emb"] = emb
    return params


# ---------------------------------------------------------------------------
# Wrapper
# ---------------------------------------------------------------------------
def decoder_forward(token_ids, enc, params, *, num_heads, noise_seed=0):
    batch, seq = token_ids.shape
    emb_size = enc.shape[-1]
    num_layers = params["wq"].shape[0]
    vocab = params["emb"].shape[0]
    hidden = params["w1"].shape[-1]
    n_rows = batch * seq

    pos = sinusoidal_table(seq, emb_size)
    enc_flat = enc.astype(jnp.float32).reshape(n_rows, emb_size)
    # torch.normal(outputs) == outputs + N(0, 1): pre-sample per layer.
    # TODO(synk): statistically equivalent but not bit-identical to torch's RNG.
    noise = jax.random.normal(jax.random.PRNGKey(noise_seed),
                              (num_layers, n_rows, emb_size), jnp.float32)

    const2 = lambda l, ids: (0, 0)
    per_layer = lambda l, ids: (l, 0, 0)

    grid_spec = pltpu.PrefetchScalarGridSpec(
        num_scalar_prefetch=1,
        grid=(num_layers,),
        in_specs=[
            pl.BlockSpec((vocab, emb_size), const2),               # embedding table
            pl.BlockSpec((seq, emb_size), const2),                 # positional table
            pl.BlockSpec((n_rows, emb_size), const2),              # encoder output
            pl.BlockSpec((1, emb_size, emb_size), per_layer),      # wq
            pl.BlockSpec((1, 1, emb_size), per_layer),             # bq
            pl.BlockSpec((1, emb_size, 2 * emb_size), per_layer),  # wkv (fused K|V)
            pl.BlockSpec((1, 1, 2 * emb_size), per_layer),         # bkv
            pl.BlockSpec((1, emb_size, emb_size), per_layer),      # wo
            pl.BlockSpec((1, 1, emb_size), per_layer),             # bo
            pl.BlockSpec((1, emb_size, hidden), per_layer),        # w1
            pl.BlockSpec((1, 1, hidden), per_layer),               # b1
            pl.BlockSpec((1, hidden, emb_size), per_layer),        # w2
            pl.BlockSpec((1, 1, emb_size), per_layer),             # b2
            pl.BlockSpec((1, n_rows, emb_size), per_layer),        # per-layer noise
        ],
        out_specs=pl.BlockSpec((n_rows, emb_size), const2),
        scratch_shapes=[pltpu.VMEM((n_rows, emb_size), jnp.float32)],
    )

    kernel = functools.partial(decoder_stack_kernel, num_heads=num_heads,
                               batch=batch, seq=seq)

    out = pl.pallas_call(
        kernel,
        out_shape=jax.ShapeDtypeStruct((n_rows, emb_size), jnp.float32),
        grid_spec=grid_spec,
        compiler_params=pltpu.CompilerParams(
            dimension_semantics=("arbitrary",)),   # layers carry state sequentially
    )(token_ids.astype(jnp.int32), params["emb"], pos, enc_flat,
      params["wq"], params["bq"], params["wkv"], params["bkv"],
      params["wo"], params["bo"], params["w1"], params["b1"],
      params["w2"], params["b2"], noise)

    return out.reshape(batch, seq, emb_size)


if __name__ == "__main__":
    B, S, E, H = 2, 8, 32, 4        # batch, seq, emb_size, num_heads
    L, V = 2, 16                    # num_decoders, num_en (vocab size)

    root = jax.random.PRNGKey(0)
    k_ids, k_enc, k_par = jax.random.split(root, 3)

    token_ids = jax.random.randint(k_ids, (B, S), 0, V, dtype=jnp.int32)
    enc = jax.random.normal(k_enc, (B, S, E), jnp.float32)
    params = init_params(k_par, L, V, E)

    out = decoder_forward(token_ids, enc, params, num_heads=H, noise_seed=1234)
    out = jax.block_until_ready(out)

    assert out.shape == (B, S, E) and out.dtype == jnp.float32
    assert bool(jnp.all(jnp.isfinite(out)))
    print("KERNEL_OK")
</pallas_src>

<mosaic_0001>
module attributes {stable_mosaic.version = 11 : i64} {
  func.func @decoder_stack_kernel(%arg0: i32, %arg1: memref<2x8xi32, #tpu.memory_space<smem>>, %arg2: memref<16x32xf32, #tpu.memory_space<vmem>>, %arg3: memref<8x32xf32, #tpu.memory_space<vmem>>, %arg4: memref<16x32xf32, #tpu.memory_space<vmem>>, %arg5: memref<1x32x32xbf16, #tpu.memory_space<vmem>>, %arg6: memref<1x1x32xf32, #tpu.memory_space<vmem>>, %arg7: memref<1x32x64xbf16, #tpu.memory_space<vmem>>, %arg8: memref<1x1x64xf32, #tpu.memory_space<vmem>>, %arg9: memref<1x32x32xbf16, #tpu.memory_space<vmem>>, %arg10: memref<1x1x32xf32, #tpu.memory_space<vmem>>, %arg11: memref<1x32x128xbf16, #tpu.memory_space<vmem>>, %arg12: memref<1x1x128xf32, #tpu.memory_space<vmem>>, %arg13: memref<1x128x32xbf16, #tpu.memory_space<vmem>>, %arg14: memref<1x1x32xf32, #tpu.memory_space<vmem>>, %arg15: memref<1x16x32xf32, #tpu.memory_space<vmem>>, %arg16: memref<16x32xf32, #tpu.memory_space<vmem>>, %arg17: memref<16x32xf32, #tpu.memory_space<vmem>>) attributes {dimension_semantics = [#tpu.dimension_semantics<arbitrary>], iteration_bounds = array<i64: 2>, scalar_prefetch = 1 : i64, scratch_operands = 1 : i64, tpu.core_type = #tpu.core_type<tc>, window_params = [{pipeline_mode = #tpu.pipeline_mode<synchronous>, transform_indices = @transform_0, window_bounds = array<i64: 16, 32>}, {pipeline_mode = #tpu.pipeline_mode<synchronous>, transform_indices = @transform_1, window_bounds = array<i64: 8, 32>}, {pipeline_mode = #tpu.pipeline_mode<synchronous>, transform_indices = @transform_2, window_bounds = array<i64: 16, 32>}, {transform_indices = @transform_3, window_bounds = array<i64: 1, 32, 32>}, {transform_indices = @transform_4, window_bounds = array<i64: 1, 1, 32>}, {transform_indices = @transform_5, window_bounds = array<i64: 1, 32, 64>}, {transform_indices = @transform_6, window_bounds = array<i64: 1, 1, 64>}, {transform_indices = @transform_7, window_bounds = array<i64: 1, 32, 32>}, {transform_indices = @transform_8, window_bounds = array<i64: 1, 1, 32>}, {transform_indices = @transform_9, window_bounds = array<i64: 1, 32, 128>}, {transform_indices = @transform_10, window_bounds = array<i64: 1, 1, 128>}, {transform_indices = @transform_11, window_bounds = array<i64: 1, 128, 32>}, {transform_indices = @transform_12, window_bounds = array<i64: 1, 1, 32>}, {transform_indices = @transform_13, window_bounds = array<i64: 1, 16, 32>}, {pipeline_mode = #tpu.pipeline_mode<synchronous>, transform_indices = @transform_14, window_bounds = array<i64: 16, 32>}]} {
    %c0_i32 = arith.constant 0 : i32
    %0 = arith.cmpi eq, %arg0, %c0_i32 : i32
    %1 = arith.extui %0 : i1 to i32
    %c0_i32_0 = arith.constant 0 : i32
    %2 = arith.cmpi ne, %1, %c0_i32_0 : i32
    scf.if %2 {
      %c0_51 = arith.constant 0 : index
      %c0_52 = arith.constant 0 : index
      %89 = memref.load %arg1[%c0_51, %c0_52] : memref<2x8xi32, #tpu.memory_space<smem>>
      %90 = arith.index_cast %89 : i32 to index
      %c0_53 = arith.constant 0 : index
      %91 = vector.load %arg2[%90, %c0_53] : memref<16x32xf32, #tpu.memory_space<vmem>>, vector<1x32xf32>
      %cst_54 = arith.constant 5.65685415 : f32
      %92 = vector.broadcast %cst_54 : f32 to vector<1x32xf32>
      %93 = arith.mulf %91, %92 : vector<1x32xf32>
      %c0_55 = arith.constant 0 : index
      %c0_56 = arith.constant 0 : index
      %94 = vector.load %arg3[%c0_55, %c0_56] : memref<8x32xf32, #tpu.memory_space<vmem>>, vector<1x32xf32>
      %95 = arith.addf %93, %94 : vector<1x32xf32>
      %c0_57 = arith.constant 0 : index
      %c0_58 = arith.constant 0 : index
      %96 = vector.load %arg17[%c0_57, %c0_58] : memref<16x32xf32, #tpu.memory_space<vmem>>, vector<1x32xf32>
      tpu.vector_store %arg17[%c0_57, %c0_58], %95 {strides = array<i32>} : memref<16x32xf32, #tpu.memory_space<vmem>>, vector<1x32xf32>,
      %c0_59 = arith.constant 0 : index
      %c1 = arith.constant 1 : index
      %97 = memref.load %arg1[%c0_59, %c1] : memref<2x8xi32, #tpu.memory_space<smem>>
      %98 = arith.index_cast %97 : i32 to index
      %c0_60 = arith.constant 0 : index
      %99 = vector.load %arg2[%98, %c0_60] : memref<16x32xf32, #tpu.memory_space<vmem>>, vector<1x32xf32>
      %cst_61 = arith.constant 5.65685415 : f32
      %100 = vector.broadcast %cst_61 : f32 to vector<1x32xf32>
      %101 = arith.mulf %99, %100 : vector<1x32xf32>
      %c1_62 = arith.constant 1 : index
      %c0_63 = arith.constant 0 : index
      %102 = vector.load %arg3[%c1_62, %c0_63] : memref<8x32xf32, #tpu.memory_space<vmem>>, vector<1x32xf32>
      %103 = arith.addf %101, %102 : vector<1x32xf32>
      %c1_64 = arith.constant 1 : index
      %c0_65 = arith.constant 0 : index
      %104 = vector.load %arg17[%c1_64, %c0_65] : memref<16x32xf32, #tpu.memory_space<vmem>>, vector<1x32xf32>
      tpu.vector_store %arg17[%c1_64, %c0_65], %103 {strides = array<i32>} : memref<16x32xf32, #tpu.memory_space<vmem>>, vector<1x32xf32>,
      %c0_66 = arith.constant 0 : index
      %c2 = arith.constant 2 : index
      %105 = memref.load %arg1[%c0_66, %c2] : memref<2x8xi32, #tpu.memory_space<smem>>
      %106 = arith.index_cast %105 : i32 to index
      %c0_67 = arith.constant 0 : index
      %107 = vector.load %arg2[%106, %c0_67] : memref<16x32xf32, #tpu.memory_space<vmem>>, vector<1x32xf32>
      %cst_68 = arith.constant 5.65685415 : f32
      %108 = vector.broadcast %cst_68 : f32 to vector<1x32xf32>
      %109 = arith.mulf %107, %108 : vector<1x32xf32>
      %c2_69 = arith.constant 2 : index
      %c0_70 = arith.constant 0 : index
      %110 = vector.load %arg3[%c2_69, %c0_70] : memref<8x32xf32, #tpu.memory_space<vmem>>, vector<1x32xf32>
      %111 = arith.addf %109, %110 : vector<1x32xf32>
      %c2_71 = arith.constant 2 : index
      %c0_72 = arith.constant 0 : index
      %112 = vector.load %arg17[%c2_71, %c0_72] : memref<16x32xf32, #tpu.memory_space<vmem>>, vector<1x32xf32>
      tpu.vector_store %arg17[%c2_71, %c0_72], %111 {strides = array<i32>} : memref<16x32xf32, #tpu.memory_space<vmem>>, vector<1x32xf32>,
      %c0_73 = arith.constant 0 : index
      %c3 = arith.constant 3 : index
      %113 = memref.load %arg1[%c0_73, %c3] : memref<2x8xi32, #tpu.memory_space<smem>>
      %114 = arith.index_cast %113 : i32 to index
      %c0_74 = arith.constant 0 : index
      %115 = vector.load %arg2[%114, %c0_74] : memref<16x32xf32, #tpu.memory_space<vmem>>, vector<1x32xf32>
      %cst_75 = arith.constant 5.65685415 : f32
      %116 = vector.broadcast %cst_75 : f32 to vector<1x32xf32>
      %117 = arith.mulf %115, %116 : vector<1x32xf32>
      %c3_76 = arith.constant 3 : index
      %c0_77 = arith.constant 0 : index
      %118 = vector.load %arg3[%c3_76, %c0_77] : memref<8x32xf32, #tpu.memory_space<vmem>>, vector<1x32xf32>
      %119 = arith.addf %117, %118 : vector<1x32xf32>
      %c3_78 = arith.constant 3 : index
      %c0_79 = arith.constant 0 : index
      %120 = vector.load %arg17[%c3_78, %c0_79] : memref<16x32xf32, #tpu.memory_space<vmem>>, vector<1x32xf32>
      tpu.vector_store %arg17[%c3_78, %c0_79], %119 {strides = array<i32>} : memref<16x32xf32, #tpu.memory_space<vmem>>, vector<1x32xf32>,
      %c0_80 = arith.constant 0 : index
      %c4 = arith.constant 4 : index
      %121 = memref.load %arg1[%c0_80, %c4] : memref<2x8xi32, #tpu.memory_space<smem>>
      %122 = arith.index_cast %121 : i32 to index
      %c0_81 = arith.constant 0 : index
      %123 = vector.load %arg2[%122, %c0_81] : memref<16x32xf32, #tpu.memory_space<vmem>>, vector<1x32xf32>
      %cst_82 = arith.constant 5.65685415 : f32
      %124 = vector.broadcast %cst_82 : f32 to vector<1x32xf32>
      %125 = arith.mulf %123, %124 : vector<1x32xf32>
      %c4_83 = arith.constant 4 : index
      %c0_84 = arith.constant 0 : index
      %126 = vector.load %arg3[%c4_83, %c0_84] : memref<8x32xf32, #tpu.memory_space<vmem>>, vector<1x32xf32>
      %127 = arith.addf %125, %126 : vector<1x32xf32>
      %c4_85 = arith.constant 4 : index
      %c0_86 = arith.constant 0 : index
      %128 = vector.load %arg17[%c4_85, %c0_86] : memref<16x32xf32, #tpu.memory_space<vmem>>, vector<1x32xf32>
      tpu.vector_store %arg17[%c4_85, %c0_86], %127 {strides = array<i32>} : memref<16x32xf32, #tpu.memory_space<vmem>>, vector<1x32xf32>,
      %c0_87 = arith.constant 0 : index
      %c5 = arith.constant 5 : index
      %129 = memref.load %arg1[%c0_87, %c5] : memref<2x8xi32, #tpu.memory_space<smem>>
      %130 = arith.index_cast %129 : i32 to index
      %c0_88 = arith.constant 0 : index
      %131 = vector.load %arg2[%130, %c0_88] : memref<16x32xf32, #tpu.memory_space<vmem>>, vector<1x32xf32>
      %cst_89 = arith.constant 5.65685415 : f32
      %132 = vector.broadcast %cst_89 : f32 to vector<1x32xf32>
      %133 = arith.mulf %131, %132 : vector<1x32xf32>
      %c5_90 = arith.constant 5 : index
      %c0_91 = arith.constant 0 : index
      %134 = vector.load %arg3[%c5_90, %c0_91] : memref<8x32xf32, #tpu.memory_space<vmem>>, vector<1x32xf32>
      %135 = arith.addf %133, %134 : vector<1x32xf32>
      %c5_92 = arith.constant 5 : index
      %c0_93 = arith.constant 0 : index
      %136 = vector.load %arg17[%c5_92, %c0_93] : memref<16x32xf32, #tpu.memory_space<vmem>>, vector<1x32xf32>
      tpu.vector_store %arg17[%c5_92, %c0_93], %135 {strides = array<i32>} : memref<16x32xf32, #tpu.memory_space<vmem>>, vector<1x32xf32>,
      %c0_94 = arith.constant 0 : index
      %c6 = arith.constant 6 : index
      %137 = memref.load %arg1[%c0_94, %c6] : memref<2x8xi32, #tpu.memory_space<smem>>
      %138 = arith.index_cast %137 : i32 to index
      %c0_95 = arith.constant 0 : index
      %139 = vector.load %arg2[%138, %c0_95] : memref<16x32xf32, #tpu.memory_space<vmem>>, vector<1x32xf32>
      %cst_96 = arith.constant 5.65685415 : f32
      %140 = vector.broadcast %cst_96 : f32 to vector<1x32xf32>
      %141 = arith.mulf %139, %140 : vector<1x32xf32>
      %c6_97 = arith.constant 6 : index
      %c0_98 = arith.constant 0 : index
      %142 = vector.load %arg3[%c6_97, %c0_98] : memref<8x32xf32, #tpu.memory_space<vmem>>, vector<1x32xf32>
      %143 = arith.addf %141, %142 : vector<1x32xf32>
      %c6_99 = arith.constant 6 : index
      %c0_100 = arith.constant 0 : index
      %144 = vector.load %arg17[%c6_99, %c0_100] : memref<16x32xf32, #tpu.memory_space<vmem>>, vector<1x32xf32>
      tpu.vector_store %arg17[%c6_99, %c0_100], %143 {strides = array<i32>} : memref<16x32xf32, #tpu.memory_space<vmem>>, vector<1x32xf32>,
      %c0_101 = arith.constant 0 : index
      %c7 = arith.constant 7 : index
      %145 = memref.load %arg1[%c0_101, %c7] : memref<2x8xi32, #tpu.memory_space<smem>>
      %146 = arith.index_cast %145 : i32 to index
      %c0_102 = arith.constant 0 : index
      %147 = vector.load %arg2[%146, %c0_102] : memref<16x32xf32, #tpu.memory_space<vmem>>, vector<1x32xf32>
      %cst_103 = arith.constant 5.65685415 : f32
      %148 = vector.broadcast %cst_103 : f32 to vector<1x32xf32>
      %149 = arith.mulf %147, %148 : vector<1x32xf32>
      %c7_104 = arith.constant 7 : index
      %c0_105 = arith.constant 0 : index
      %150 = vector.load %arg3[%c7_104, %c0_105] : memref<8x32xf32, #tpu.memory_space<vmem>>, vector<1x32xf32>
      %151 = arith.addf %149, %150 : vector<1x32xf32>
      %c7_106 = arith.constant 7 : index
      %c0_107 = arith.constant 0 : index
      %152 = vector.load %arg17[%c7_106, %c0_107] : memref<16x32xf32, #tpu.memory_space<vmem>>, vector<1x32xf32>
      tpu.vector_store %arg17[%c7_106, %c0_107], %151 {strides = array<i32>} : memref<16x32xf32, #tpu.memory_space<vmem>>, vector<1x32xf32>,
      %c1_108 = arith.constant 1 : index
      %c0_109 = arith.constant 0 : index
      %153 = memref.load %arg1[%c1_108, %c0_109] : memref<2x8xi32, #tpu.memory_space<smem>>
      %154 = arith.index_cast %153 : i32 to index
      %c0_110 = arith.constant 0 : index
      %155 = vector.load %arg2[%154, %c0_110] : memref<16x32xf32, #tpu.memory_space<vmem>>, vector<1x32xf32>
      %cst_111 = arith.constant 5.65685415 : f32
      %156 = vector.broadcast %cst_111 : f32 to vector<1x32xf32>
      %157 = arith.mulf %155, %156 : vector<1x32xf32>
      %c0_112 = arith.constant 0 : index
      %c0_113 = arith.constant 0 : index
      %158 = vector.load %arg3[%c0_112, %c0_113] : memref<8x32xf32, #tpu.memory_space<vmem>>, vector<1x32xf32>
      %159 = arith.addf %157, %158 : vector<1x32xf32>
      %c8 = arith.constant 8 : index
      %c0_114 = arith.constant 0 : index
      %160 = vector.load %arg17[%c8, %c0_114] : memref<16x32xf32, #tpu.memory_space<vmem>>, vector<1x32xf32>
      tpu.vector_store %arg17[%c8, %c0_114], %159 {strides = array<i32>} : memref<16x32xf32, #tpu.memory_space<vmem>>, vector<1x32xf32>,
      %c1_115 = arith.constant 1 : index
      %c1_116 = arith.constant 1 : index
      %161 = memref.load %arg1[%c1_115, %c1_116] : memref<2x8xi32, #tpu.memory_space<smem>>
      %162 = arith.index_cast %161 : i32 to index
      %c0_117 = arith.constant 0 : index
      %163 = vector.load %arg2[%162, %c0_117] : memref<16x32xf32, #tpu.memory_space<vmem>>, vector<1x32xf32>
      %cst_118 = arith.constant 5.65685415 : f32
      %164 = vector.broadcast %cst_118 : f32 to vector<1x32xf32>
      %165 = arith.mulf %163, %164 : vector<1x32xf32>
      %c1_119 = arith.constant 1 : index
      %c0_120 = arith.constant 0 : index
      %166 = vector.load %arg3[%c1_119, %c0_120] : memref<8x32xf32, #tpu.memory_space<vmem>>, vector<1x32xf32>
      %167 = arith.addf %165, %166 : vector<1x32xf32>
      %c9 = arith.constant 9 : index
      %c0_121 = arith.constant 0 : index
      %168 = vector.load %arg17[%c9, %c0_121] : memref<16x32xf32, #tpu.memory_space<vmem>>, vector<1x32xf32>
      tpu.vector_store %arg17[%c9, %c0_121], %167 {strides = array<i32>} : memref<16x32xf32, #tpu.memory_space<vmem>>, vector<1x32xf32>,
      %c1_122 = arith.constant 1 : index
      %c2_123 = arith.constant 2 : index
      %169 = memref.load %arg1[%c1_122, %c2_123] : memref<2x8xi32, #tpu.memory_space<smem>>
      %170 = arith.index_cast %169 : i32 to index
      %c0_124 = arith.constant 0 : index
      %171 = vector.load %arg2[%170, %c0_124] : memref<16x32xf32, #tpu.memory_space<vmem>>, vector<1x32xf32>
      %cst_125 = arith.constant 5.65685415 : f32
      %172 = vector.broadcast %cst_125 : f32 to vector<1x32xf32>
      %173 = arith.mulf %171, %172 : vector<1x32xf32>
      %c2_126 = arith.constant 2 : index
      %c0_127 = arith.constant 0 : index
      %174 = vector.load %arg3[%c2_126, %c0_127] : memref<8x32xf32, #tpu.memory_space<vmem>>, vector<1x32xf32>
      %175 = arith.addf %173, %174 : vector<1x32xf32>
      %c10 = arith.constant 10 : index
      %c0_128 = arith.constant 0 : index
      %176 = vector.load %arg17[%c10, %c0_128] : memref<16x32xf32, #tpu.memory_space<vmem>>, vector<1x32xf32>
      tpu.vector_store %arg17[%c10, %c0_128], %175 {strides = array<i32>} : memref<16x32xf32, #tpu.memory_space<vmem>>, vector<1x32xf32>,
      %c1_129 = arith.constant 1 : index
      %c3_130 = arith.constant 3 : index
      %177 = memref.load %arg1[%c1_129, %c3_130] : memref<2x8xi32, #tpu.memory_space<smem>>
      %178 = arith.index_cast %177 : i32 to index
      %c0_131 = arith.constant 0 : index
      %179 = vector.load %arg2[%178, %c0_131] : memref<16x32xf32, #tpu.memory_space<vmem>>, vector<1x32xf32>
      %cst_132 = arith.constant 5.65685415 : f32
      %180 = vector.broadcast %cst_132 : f32 to vector<1x32xf32>
      %181 = arith.mulf %179, %180 : vector<1x32xf32>
      %c3_133 = arith.constant 3 : index
      %c0_134 = arith.constant 0 : index
      %182 = vector.load %arg3[%c3_133, %c0_134] : memref<8x32xf32, #tpu.memory_space<vmem>>, vector<1x32xf32>
      %183 = arith.addf %181, %182 : vector<1x32xf32>
      %c11 = arith.constant 11 : index
      %c0_135 = arith.constant 0 : index
      %184 = vector.load %arg17[%c11, %c0_135] : memref<16x32xf32, #tpu.memory_space<vmem>>, vector<1x32xf32>
      tpu.vector_store %arg17[%c11, %c0_135], %183 {strides = array<i32>} : memref<16x32xf32, #tpu.memory_space<vmem>>, vector<1x32xf32>,
      %c1_136 = arith.constant 1 : index
      %c4_137 = arith.constant 4 : index
      %185 = memref.load %arg1[%c1_136, %c4_137] : memref<2x8xi32, #tpu.memory_space<smem>>
      %186 = arith.index_cast %185 : i32 to index
      %c0_138 = arith.constant 0 : index
      %187 = vector.load %arg2[%186, %c0_138] : memref<16x32xf32, #tpu.memory_space<vmem>>, vector<1x32xf32>
      %cst_139 = arith.constant 5.65685415 : f32
      %188 = vector.broadcast %cst_139 : f32 to vector<1x32xf32>
      %189 = arith.mulf %187, %188 : vector<1x32xf32>
      %c4_140 = arith.constant 4 : index
      %c0_141 = arith.constant 0 : index
      %190 = vector.load %arg3[%c4_140, %c0_141] : memref<8x32xf32, #tpu.memory_space<vmem>>, vector<1x32xf32>
      %191 = arith.addf %189, %190 : vector<1x32xf32>
      %c12 = arith.constant 12 : index
      %c0_142 = arith.constant 0 : index
      %192 = vector.load %arg17[%c12, %c0_142] : memref<16x32xf32, #tpu.memory_space<vmem>>, vector<1x32xf32>
      tpu.vector_store %arg17[%c12, %c0_142], %191 {strides = array<i32>} : memref<16x32xf32, #tpu.memory_space<vmem>>, vector<1x32xf32>,
      %c1_143 = arith.constant 1 : index
      %c5_144 = arith.constant 5 : index
      %193 = memref.load %arg1[%c1_143, %c5_144] : memref<2x8xi32, #tpu.memory_space<smem>>
      %194 = arith.index_cast %193 : i32 to index
      %c0_145 = arith.constant 0 : index
      %195 = vector.load %arg2[%194, %c0_145] : memref<16x32xf32, #tpu.memory_space<vmem>>, vector<1x32xf32>
      %cst_146 = arith.constant 5.65685415 : f32
      %196 = vector.broadcast %cst_146 : f32 to vector<1x32xf32>
      %197 = arith.mulf %195, %196 : vector<1x32xf32>
      %c5_147 = arith.constant 5 : index
      %c0_148 = arith.constant 0 : index
      %198 = vector.load %arg3[%c5_147, %c0_148] : memref<8x32xf32, #tpu.memory_space<vmem>>, vector<1x32xf32>
      %199 = arith.addf %197, %198 : vector<1x32xf32>
      %c13 = arith.constant 13 : index
      %c0_149 = arith.constant 0 : index
      %200 = vector.load %arg17[%c13, %c0_149] : memref<16x32xf32, #tpu.memory_space<vmem>>, vector<1x32xf32>
      tpu.vector_store %arg17[%c13, %c0_149], %199 {strides = array<i32>} : memref<16x32xf32, #tpu.memory_space<vmem>>, vector<1x32xf32>,
      %c1_150 = arith.constant 1 : index
      %c6_151 = arith.constant 6 : index
      %201 = memref.load %arg1[%c1_150, %c6_151] : memref<2x8xi32, #tpu.memory_space<smem>>
      %202 = arith.index_cast %201 : i32 to index
      %c0_152 = arith.constant 0 : index
      %203 = vector.load %arg2[%202, %c0_152] : memref<16x32xf32, #tpu.memory_space<vmem>>, vector<1x32xf32>
      %cst_153 = arith.constant 5.65685415 : f32
      %204 = vector.broadcast %cst_153 : f32 to vector<1x32xf32>
      %205 = arith.mulf %203, %204 : vector<1x32xf32>
      %c6_154 = arith.constant 6 : index
      %c0_155 = arith.constant 0 : index
      %206 = vector.load %arg3[%c6_154, %c0_155] : memref<8x32xf32, #tpu.memory_space<vmem>>, vector<1x32xf32>
      %207 = arith.addf %205, %206 : vector<1x32xf32>
      %c14 = arith.constant 14 : index
      %c0_156 = arith.constant 0 : index
      %208 = vector.load %arg17[%c14, %c0_156] : memref<16x32xf32, #tpu.memory_space<vmem>>, vector<1x32xf32>
      tpu.vector_store %arg17[%c14, %c0_156], %207 {strides = array<i32>} : memref<16x32xf32, #tpu.memory_space<vmem>>, vector<1x32xf32>,
      %c1_157 = arith.constant 1 : index
      %c7_158 = arith.constant 7 : index
      %209 = memref.load %arg1[%c1_157, %c7_158] : memref<2x8xi32, #tpu.memory_space<smem>>
      %210 = arith.index_cast %209 : i32 to index
      %c0_159 = arith.constant 0 : index
      %211 = vector.load %arg2[%210, %c0_159] : memref<16x32xf32, #tpu.memory_space<vmem>>, vector<1x32xf32>
      %cst_160 = arith.constant 5.65685415 : f32
      %212 = vector.broadcast %cst_160 : f32 to vector<1x32xf32>
      %213 = arith.mulf %211, %212 : vector<1x32xf32>
      %c7_161 = arith.constant 7 : index
      %c0_162 = arith.constant 0 : index
      %214 = vector.load %arg3[%c7_161, %c0_162] : memref<8x32xf32, #tpu.memory_space<vmem>>, vector<1x32xf32>
      %215 = arith.addf %213, %214 : vector<1x32xf32>
      %c15 = arith.constant 15 : index
      %c0_163 = arith.constant 0 : index
      %216 = vector.load %arg17[%c15, %c0_163] : memref<16x32xf32, #tpu.memory_space<vmem>>, vector<1x32xf32>
      tpu.vector_store %arg17[%c15, %c0_163], %215 {strides = array<i32>} : memref<16x32xf32, #tpu.memory_space<vmem>>, vector<1x32xf32>,
    } else {
    }
    %c0 = arith.constant 0 : index
    %c0_1 = arith.constant 0 : index
    %3 = vector.load %arg17[%c0, %c0_1] : memref<16x32xf32, #tpu.memory_space<vmem>>, vector<16x32xf32>
    %c0_2 = arith.constant 0 : index
    %c0_3 = arith.constant 0 : index
    %4 = vector.load %arg4[%c0_2, %c0_3] : memref<16x32xf32, #tpu.memory_space<vmem>>, vector<16x32xf32>
    %c0_4 = arith.constant 0 : index
    %c0_5 = arith.constant 0 : index
    %c0_6 = arith.constant 0 : index
    %5 = vector.load %arg5[%c0_4, %c0_5, %c0_6] : memref<1x32x32xbf16, #tpu.memory_space<vmem>>, vector<1x32x32xbf16>
    %6 = vector.shape_cast %5 : vector<1x32x32xbf16> to vector<32x32xbf16>
    %7 = arith.truncf %3 : vector<16x32xf32> to vector<16x32xbf16>
    %cst = arith.constant dense<0.000000e+00> : vector<16x32xf32>
    %8 = tpu.matmul %7, %6, %cst {dimension_numbers = #tpu.dot_dimension_numbers<[1], [0], [0], [1], [0, 0, 1, 1], [], []>} : vector<16x32xbf16>, vector<32x32xbf16>, vector<16x32xf32> -> vector<16x32xf32>
    %c0_7 = arith.constant 0 : index
    %c0_8 = arith.constant 0 : index
    %c0_9 = arith.constant 0 : index
    %9 = vector.load %arg6[%c0_7, %c0_8, %c0_9] : memref<1x1x32xf32, #tpu.memory_space<vmem>>, vector<1x1x32xf32>
    %10 = vector.shape_cast %9 : vector<1x1x32xf32> to vector<1x32xf32>
    %11 = vector.broadcast %10 : vector<1x32xf32> to vector<16x32xf32>
    %12 = arith.addf %8, %11 : vector<16x32xf32>
    %cst_10 = arith.constant 0.353553385 : f32
    %13 = vector.broadcast %cst_10 : f32 to vector<16x32xf32>
    %14 = arith.mulf %12, %13 : vector<16x32xf32>
    %c0_11 = arith.constant 0 : index
    %c0_12 = arith.constant 0 : index
    %c0_13 = arith.constant 0 : index
    %15 = vector.load %arg7[%c0_11, %c0_12, %c0_13] : memref<1x32x64xbf16, #tpu.memory_space<vmem>>, vector<1x32x64xbf16>
    %16 = vector.shape_cast %15 : vector<1x32x64xbf16> to vector<32x64xbf16>
    %17 = arith.truncf %4 : vector<16x32xf32> to vector<16x32xbf16>
    %cst_14 = arith.constant dense<0.000000e+00> : vector<16x64xf32>
    %18 = tpu.matmul %17, %16, %cst_14 {dimension_numbers = #tpu.dot_dimension_numbers<[1], [0], [0], [1], [0, 0, 1, 1], [], []>} : vector<16x32xbf16>, vector<32x64xbf16>, vector<16x64xf32> -> vector<16x64xf32>
    %c0_15 = arith.constant 0 : index
    %c0_16 = arith.constant 0 : index
    %c0_17 = arith.constant 0 : index
    %19 = vector.load %arg8[%c0_15, %c0_16, %c0_17] : memref<1x1x64xf32, #tpu.memory_space<vmem>>, vector<1x1x64xf32>
    %20 = vector.shape_cast %19 : vector<1x1x64xf32> to vector<1x64xf32>
    %21 = vector.broadcast %20 : vector<1x64xf32> to vector<16x64xf32>
    %22 = arith.addf %18, %21 : vector<16x64xf32>
    %23 = vector.extract_strided_slice %22 {offsets = [0, 0], sizes = [16, 32], strides = [1, 1]} : vector<16x64xf32> to vector<16x32xf32>
    %24 = vector.extract_strided_slice %22 {offsets = [0, 32], sizes = [16, 32], strides = [1, 1]} : vector<16x64xf32> to vector<16x32xf32>
    %25 = vector.shape_cast %14 : vector<16x32xf32> to vector<2x8x4x8xf32>
    %26 = tpu.transpose %25, [0, 2, 1, 3] : vector<2x8x4x8xf32> -> vector<2x4x8x8xf32>
    %27 = vector.shape_cast %26 : vector<2x4x8x8xf32> to vector<8x8x8xf32>
    %28 = arith.truncf %27 : vector<8x8x8xf32> to vector<8x8x8xbf16>
    %29 = vector.shape_cast %23 : vector<16x32xf32> to vector<2x8x4x8xf32>
    %30 = tpu.transpose %29, [0, 2, 1, 3] : vector<2x8x4x8xf32> -> vector<2x4x8x8xf32>
    %31 = vector.shape_cast %30 : vector<2x4x8x8xf32> to vector<8x8x8xf32>
    %32 = arith.truncf %31 : vector<8x8x8xf32> to vector<8x8x8xbf16>
    %33 = vector.shape_cast %24 : vector<16x32xf32> to vector<2x8x4x8xf32>
    %34 = tpu.transpose %33, [0, 2, 1, 3] : vector<2x8x4x8xf32> -> vector<2x4x8x8xf32>
    %35 = vector.shape_cast %34 : vector<2x4x8x8xf32> to vector<8x8x8xf32>
    %36 = arith.truncf %35 : vector<8x8x8xf32> to vector<8x8x8xbf16>
    "tpu.trace_start"() <{level = 10 : i32, message = "nqd,nkd->nqk"}> : () -> ()
    %cst_18 = arith.constant dense<0.000000e+00> : vector<8x8x8xf32>
    %37 = tpu.matmul %28, %32, %cst_18 {dimension_numbers = #tpu.dot_dimension_numbers<[2], [2], [1], [1], [0, 0, 0, 1, 1, 1], [0], [0]>} : vector<8x8x8xbf16>, vector<8x8x8xbf16>, vector<8x8x8xf32> -> vector<8x8x8xf32>
    "tpu.trace_stop"() : () -> ()
    %cst_19 = arith.constant dense<0xFF800000> : vector<8x8xf32>
    %38 = vector.multi_reduction <maximumf>, %37, %cst_19 [2] : vector<8x8x8xf32> to vector<8x8xf32>
    %39 = vector.shape_cast %38 : vector<8x8xf32> to vector<8x8x1xf32>
    %40 = vector.broadcast %39 : vector<8x8x1xf32> to vector<8x8x8xf32>
    %41 = arith.subf %37, %40 : vector<8x8x8xf32>
    %42 = math.exp %41 : vector<8x8x8xf32>
    %cst_20 = arith.constant dense<0.000000e+00> : vector<8x8xf32>
    %43 = vector.multi_reduction <add>, %42, %cst_20 [2] : vector<8x8x8xf32> to vector<8x8xf32>
    %44 = vector.shape_cast %43 : vector<8x8xf32> to vector<8x8x1xf32>
    %cst_21 = arith.constant 1.000000e+00 : f32
    %45 = vector.broadcast %cst_21 : f32 to vector<8x8x1xf32>
    %46 = arith.divf %45, %44 : vector<8x8x1xf32>
    %47 = vector.broadcast %46 : vector<8x8x1xf32> to vector<8x8x8xf32>
    %48 = arith.mulf %42, %47 : vector<8x8x8xf32>
    %49 = arith.truncf %48 : vector<8x8x8xf32> to vector<8x8x8xbf16>
    "tpu.trace_start"() <{level = 10 : i32, message = "nqk,nkd->nqd"}> : () -> ()
    %cst_22 = arith.constant dense<0.000000e+00> : vector<8x8x8xf32>
    %50 = tpu.matmul %49, %36, %cst_22 {dimension_numbers = #tpu.dot_dimension_numbers<[2], [1], [1], [2], [0, 0, 0, 1, 1, 2], [0], [0]>} : vector<8x8x8xbf16>, vector<8x8x8xbf16>, vector<8x8x8xf32> -> vector<8x8x8xf32>
    "tpu.trace_stop"() : () -> ()
    %51 = vector.shape_cast %50 : vector<8x8x8xf32> to vector<2x4x8x8xf32>
    %52 = tpu.transpose %51, [0, 2, 1, 3] : vector<2x4x8x8xf32> -> vector<2x8x4x8xf32>
    %53 = vector.shape_cast %52 : vector<2x8x4x8xf32> to vector<16x32xf32>
    %c0_23 = arith.constant 0 : index
    %c0_24 = arith.constant 0 : index
    %c0_25 = arith.constant 0 : index
    %54 = vector.load %arg9[%c0_23, %c0_24, %c0_25] : memref<1x32x32xbf16, #tpu.memory_space<vmem>>, vector<1x32x32xbf16>
    %55 = vector.shape_cast %54 : vector<1x32x32xbf16> to vector<32x32xbf16>
    %56 = arith.truncf %53 : vector<16x32xf32> to vector<16x32xbf16>
    %cst_26 = arith.constant dense<0.000000e+00> : vector<16x32xf32>
    %57 = tpu.matmul %56, %55, %cst_26 {dimension_numbers = #tpu.dot_dimension_numbers<[1], [0], [0], [1], [0, 0, 1, 1], [], []>} : vector<16x32xbf16>, vector<32x32xbf16>, vector<16x32xf32> -> vector<16x32xf32>
    %c0_27 = arith.constant 0 : index
    %c0_28 = arith.constant 0 : index
    %c0_29 = arith.constant 0 : index
    %58 = vector.load %arg10[%c0_27, %c0_28, %c0_29] : memref<1x1x32xf32, #tpu.memory_space<vmem>>, vector<1x1x32xf32>
    %59 = vector.shape_cast %58 : vector<1x1x32xf32> to vector<1x32xf32>
    %60 = vector.broadcast %59 : vector<1x32xf32> to vector<16x32xf32>
    %61 = arith.addf %57, %60 : vector<16x32xf32>
    %62 = arith.addf %61, %3 : vector<16x32xf32>
    %c0_30 = arith.constant 0 : index
    %c0_31 = arith.constant 0 : index
    %c0_32 = arith.constant 0 : index
    %63 = vector.load %arg11[%c0_30, %c0_31, %c0_32] : memref<1x32x128xbf16, #tpu.memory_space<vmem>>, vector<1x32x128xbf16>
    %64 = vector.shape_cast %63 : vector<1x32x128xbf16> to vector<32x128xbf16>
    %65 = arith.truncf %62 : vector<16x32xf32> to vector<16x32xbf16>
    %cst_33 = arith.constant dense<0.000000e+00> : vector<16x128xf32>
    %66 = tpu.matmul %65, %64, %cst_33 {dimension_numbers = #tpu.dot_dimension_numbers<[1], [0], [0], [1], [0, 0, 1, 1], [], []>} : vector<16x32xbf16>, vector<32x128xbf16>, vector<16x128xf32> -> vector<16x128xf32>
    %c0_34 = arith.constant 0 : index
    %c0_35 = arith.constant 0 : index
    %c0_36 = arith.constant 0 : index
    %67 = vector.load %arg12[%c0_34, %c0_35, %c0_36] : memref<1x1x128xf32, #tpu.memory_space<vmem>>, vector<1x1x128xf32>
    %68 = vector.shape_cast %67 : vector<1x1x128xf32> to vector<1x128xf32>
    %69 = vector.broadcast %68 : vector<1x128xf32> to vector<16x128xf32>
    %70 = arith.addf %66, %69 : vector<16x128xf32>
    %cst_37 = arith.constant 0.000000e+00 : f32
    %71 = vector.broadcast %cst_37 : f32 to vector<16x128xf32>
    %72 = arith.maximumf %70, %71 : vector<16x128xf32>
    %c0_38 = arith.constant 0 : index
    %c0_39 = arith.constant 0 : index
    %c0_40 = arith.constant 0 : index
    %73 = vector.load %arg13[%c0_38, %c0_39, %c0_40] : memref<1x128x32xbf16, #tpu.memory_space<vmem>>, vector<1x128x32xbf16>
    %74 = vector.shape_cast %73 : vector<1x128x32xbf16> to vector<128x32xbf16>
    %75 = arith.truncf %72 : vector<16x128xf32> to vector<16x128xbf16>
    %cst_41 = arith.constant dense<0.000000e+00> : vector<16x32xf32>
    %76 = tpu.matmul %75, %74, %cst_41 {dimension_numbers = #tpu.dot_dimension_numbers<[1], [0], [0], [1], [0, 0, 1, 1], [], []>} : vector<16x128xbf16>, vector<128x32xbf16>, vector<16x32xf32> -> vector<16x32xf32>
    %c0_42 = arith.constant 0 : index
    %c0_43 = arith.constant 0 : index
    %c0_44 = arith.constant 0 : index
    %77 = vector.load %arg14[%c0_42, %c0_43, %c0_44] : memref<1x1x32xf32, #tpu.memory_space<vmem>>, vector<1x1x32xf32>
    %78 = vector.shape_cast %77 : vector<1x1x32xf32> to vector<1x32xf32>
    %79 = vector.broadcast %78 : vector<1x32xf32> to vector<16x32xf32>
    %80 = arith.addf %76, %79 : vector<16x32xf32>
    %81 = arith.addf %80, %62 : vector<16x32xf32>
    %c0_45 = arith.constant 0 : index
    %c0_46 = arith.constant 0 : index
    %c0_47 = arith.constant 0 : index
    %82 = vector.load %arg15[%c0_45, %c0_46, %c0_47] : memref<1x16x32xf32, #tpu.memory_space<vmem>>, vector<1x16x32xf32>
    %83 = vector.shape_cast %82 : vector<1x16x32xf32> to vector<16x32xf32>
    %84 = arith.addf %81, %83 : vector<16x32xf32>
    %c0_48 = arith.constant 0 : index
    %c0_49 = arith.constant 0 : index
    %85 = vector.load %arg17[%c0_48, %c0_49] : memref<16x32xf32, #tpu.memory_space<vmem>>, vector<16x32xf32>
    tpu.vector_store %arg17[%c0_48, %c0_49], %84 {strides = array<i32>} : memref<16x32xf32, #tpu.memory_space<vmem>>, vector<16x32xf32>,
    %c1_i32 = arith.constant 1 : i32
    %86 = arith.cmpi eq, %arg0, %c1_i32 : i32
    %87 = arith.extui %86 : i1 to i32
    %c0_i32_50 = arith.constant 0 : i32
    %88 = arith.cmpi ne, %87, %c0_i32_50 : i32
    scf.if %88 {
      %c0_51 = arith.constant 0 : index
      %c0_52 = arith.constant 0 : index
      %89 = vector.load %arg16[%c0_51, %c0_52] : memref<16x32xf32, #tpu.memory_space<vmem>>, vector<16x32xf32>
      tpu.vector_store %arg16[%c0_51, %c0_52], %84 {strides = array<i32>} : memref<16x32xf32, #tpu.memory_space<vmem>>, vector<16x32xf32>,
    } else {
    }
    return
  }
  func.func @transform_0(%arg0: i32, %arg1: memref<2x8xi32, #tpu.memory_space<smem>>) -> (i32, i32) {
    %c0_i32 = arith.constant 0 : i32
    %c0_i32_0 = arith.constant 0 : i32
    %c0_i32_1 = arith.constant 0 : i32
    return %c0_i32, %c0_i32_0 : i32, i32
  }
  func.func @transform_1(%arg0: i32, %arg1: memref<2x8xi32, #tpu.memory_space<smem>>) -> (i32, i32) {
    %c0_i32 = arith.constant 0 : i32
    %c0_i32_0 = arith.constant 0 : i32
    %c0_i32_1 = arith.constant 0 : i32
    return %c0_i32, %c0_i32_0 : i32, i32
  }
  func.func @transform_2(%arg0: i32, %arg1: memref<2x8xi32, #tpu.memory_space<smem>>) -> (i32, i32) {
    %c0_i32 = arith.constant 0 : i32
    %c0_i32_0 = arith.constant 0 : i32
    %c0_i32_1 = arith.constant 0 : i32
    return %c0_i32, %c0_i32_0 : i32, i32
  }
  func.func @transform_3(%arg0: i32, %arg1: memref<2x8xi32, #tpu.memory_space<smem>>) -> (i32, i32, i32) {
    %c0_i32 = arith.constant 0 : i32
    %c0_i32_0 = arith.constant 0 : i32
    %c0_i32_1 = arith.constant 0 : i32
    return %arg0, %c0_i32, %c0_i32_0 : i32, i32, i32
  }
  func.func @transform_4(%arg0: i32, %arg1: memref<2x8xi32, #tpu.memory_space<smem>>) -> (i32, i32, i32) {
    %c0_i32 = arith.constant 0 : i32
    %c0_i32_0 = arith.constant 0 : i32
    %c0_i32_1 = arith.constant 0 : i32
    return %arg0, %c0_i32, %c0_i32_0 : i32, i32, i32
  }
  func.func @transform_5(%arg0: i32, %arg1: memref<2x8xi32, #tpu.memory_space<smem>>) -> (i32, i32, i32) {
    %c0_i32 = arith.constant 0 : i32
    %c0_i32_0 = arith.constant 0 : i32
    %c0_i32_1 = arith.constant 0 : i32
    return %arg0, %c0_i32, %c0_i32_0 : i32, i32, i32
  }
  func.func @transform_6(%arg0: i32, %arg1: memref<2x8xi32, #tpu.memory_space<smem>>) -> (i32, i32, i32) {
    %c0_i32 = arith.constant 0 : i32
    %c0_i32_0 = arith.constant 0 : i32
    %c0_i32_1 = arith.constant 0 : i32
    return %arg0, %c0_i32, %c0_i32_0 : i32, i32, i32
  }
  func.func @transform_7(%arg0: i32, %arg1: memref<2x8xi32, #tpu.memory_space<smem>>) -> (i32, i32, i32) {
    %c0_i32 = arith.constant 0 : i32
    %c0_i32_0 = arith.constant 0 : i32
    %c0_i32_1 = arith.constant 0 : i32
    return %arg0, %c0_i32, %c0_i32_0 : i32, i32, i32
  }
  func.func @transform_8(%arg0: i32, %arg1: memref<2x8xi32, #tpu.memory_space<smem>>) -> (i32, i32, i32) {
    %c0_i32 = arith.constant 0 : i32
    %c0_i32_0 = arith.constant 0 : i32
    %c0_i32_1 = arith.constant 0 : i32
    return %arg0, %c0_i32, %c0_i32_0 : i32, i32, i32
  }
  func.func @transform_9(%arg0: i32, %arg1: memref<2x8xi32, #tpu.memory_space<smem>>) -> (i32, i32, i32) {
    %c0_i32 = arith.constant 0 : i32
    %c0_i32_0 = arith.constant 0 : i32
    %c0_i32_1 = arith.constant 0 : i32
    return %arg0, %c0_i32, %c0_i32_0 : i32, i32, i32
  }
  func.func @transform_10(%arg0: i32, %arg1: memref<2x8xi32, #tpu.memory_space<smem>>) -> (i32, i32, i32) {
    %c0_i32 = arith.constant 0 : i32
    %c0_i32_0 = arith.constant 0 : i32
    %c0_i32_1 = arith.constant 0 : i32
    return %arg0, %c0_i32, %c0_i32_0 : i32, i32, i32
  }
  func.func @transform_11(%arg0: i32, %arg1: memref<2x8xi32, #tpu.memory_space<smem>>) -> (i32, i32, i32) {
    %c0_i32 = arith.constant 0 : i32
    %c0_i32_0 = arith.constant 0 : i32
    %c0_i32_1 = arith.constant 0 : i32
    return %arg0, %c0_i32, %c0_i32_0 : i32, i32, i32
  }
  func.func @transform_12(%arg0: i32, %arg1: memref<2x8xi32, #tpu.memory_space<smem>>) -> (i32, i32, i32) {
    %c0_i32 = arith.constant 0 : i32
    %c0_i32_0 = arith.constant 0 : i32
    %c0_i32_1 = arith.constant 0 : i32
    return %arg0, %c0_i32, %c0_i32_0 : i32, i32, i32
  }
  func.func @transform_13(%arg0: i32, %arg1: memref<2x8xi32, #tpu.memory_space<smem>>) -> (i32, i32, i32) {
    %c0_i32 = arith.constant 0 : i32
    %c0_i32_0 = arith.constant 0 : i32
    %c0_i32_1 = arith.constant 0 : i32
    return %arg0, %c0_i32, %c0_i32_0 : i32, i32, i32
  }
  func.func @transform_14(%arg0: i32, %arg1: memref<2x8xi32, #tpu.memory_space<smem>>) -> (i32, i32) {
    %c0_i32 = arith.constant 0 : i32
    %c0_i32_0 = arith.constant 0 : i32
    %c0_i32_1 = arith.constant 0 : i32
    return %c0_i32, %c0_i32_0 : i32, i32
  }
}

</mosaic_0001>

<bundles_post_ra>
// kernel: tpu_custom_call.1
= control target key start
LH: loop header
LB: loop body
LE: loop exit
PB: predicated region body
PF: predicated region fallthrough
CT: control target
= control target key end

     0   :  { %s4791_s0 = inlined_call_operand.hbm [shape: s32[2,8], index: 0, kind: input, shape index: {}]   ;;  %s4792_s1 = inlined_call_operand.hbm [shape: f32[16,32], index: 1, kind: input, shape index: {}]   ;;  %s4793_s2 = inlined_call_operand.hbm [shape: f32[8,32], index: 2, kind: input, shape index: {}]   ;;  %s4794_s3 = inlined_call_operand.hbm [shape: f32[16,32], index: 3, kind: input, shape index: {}]   ;;  %s4795_s4 = inlined_call_operand.vmem [shape: bf16[2,32,32], index: 4, kind: input, shape index: {}]   ;;  %s4796_s5 = inlined_call_operand.vmem [shape: f32[2,1,32], index: 5, kind: input, shape index: {}]   ;;  %s4797_s6 = inlined_call_operand.vmem [shape: bf16[2,32,64], index: 6, kind: input, shape index: {}]   ;;  %s4798_s7 = inlined_call_operand.vmem [shape: f32[2,1,64], index: 7, kind: input, shape index: {}]   ;;  %s4799_s8 = inlined_call_operand.vmem [shape: bf16[2,32,32], index: 8, kind: input, shape index: {}]   ;;  %s4800_s9 = inlined_call_operand.vmem [shape: f32[2,1,32], index: 9, kind: input, shape index: {}]   ;;  %s4801_s10 = inlined_call_operand.vmem [shape: bf16[2,32,128], index: 10, kind: input, shape index: {}]   ;;  %s4802_s11 = inlined_call_operand.vmem [shape: f32[2,1,128], index: 11, kind: input, shape index: {}]   ;;  %s4803_s12 = inlined_call_operand.vmem [shape: bf16[2,128,32], index: 12, kind: input, shape index: {}]   ;;  %s4804_s13 = inlined_call_operand.vmem [shape: f32[2,1,32], index: 13, kind: input, shape index: {}]   ;;  %s4805_s14 = inlined_call_operand.vmem [shape: f32[2,16,32], index: 14, kind: input, shape index: {}]   ;;  %s4806_s15 = inlined_call_operand.hbm [shape: f32[16,32], index: 15, kind: output, shape index: {}]  }
   0x1   :  { %4810 = sst [smem:[#allocation17_spill]] %s4792_s1  ;;  %s3882_s20 = scalar_lea.hbm %s4791_s0, 32 }
   0x2   :  { %4811 = sst [smem:[#allocation18_spill]] %s4793_s2  ;;  %p3883_p0 = scmp.ne.s32.totalorder %s4791_s0, %s3882_s20 }
   0x3   :  { %4812 = sst [smem:[#allocation19_spill]] %s4794_s3  ;;  %p3886_p1 = scmp.lt.u32.totalorder %s3882_s20, %s4791_s0 }
   0x4   :  { %4813 = sst [smem:[#allocation20_spill]] %s4795_s4 }
   0x5   :  { %4814 = sst [smem:[#allocation21_spill]] %s4797_s6  ;;  %p3888_p2 = pnand %p3886_p1, %p3883_p0 }
   0x6   :  { %4815 = sst [smem:[#allocation22_spill]] %s4799_s8 }
   0x7   :  { %4816 = sst [smem:[#allocation23_spill]] %s4801_s10 }
   0x8   :  { %3891 = shalt.err (!%p3888_p2)  }
   0x9   :  { %s4024_s25 = smov [#allocation4]  }
   0xa   :  { %21 = dma.hbm_to_smem %s4791_s0, 32, %s4024_s25, [#allocation3] }
   0xb   :  { %4006 = dma.done.wait [#allocation3], 32 }
   0xc   :  { %4007 = vsyncadd [#allocation3], 4294967264 }
   0xd   :  { %23 = sfence }
   0xe   :  { %24 = vsyncpa [#allocation6], 0 }
   0xf   :  { %25 = vsyncpa [#allocation9], 0 }
  0x10   :  { %26 = vsyncpa [#allocation7], 0  ;;  %s4135_s28 = smov 0  }
  0x11 LB: > { %4817 = sst [smem:[#allocation16_spill]] %s4022_s28  ;;  %s4025_s29 = smov [#allocation8]   ;;  %s4022_s28 = sphi %s4135_s28, %s32_s28  }
  0x12   : > { %s433_s30 = sshll.u32 %s4025_s29, 4  ;;  %s4141_s16 = sadd.s32 4294967295, %s4022_s28   ;;  %s434_s30 = int_to_ptr.vmem [resolvable:$true] %s433_s30 }
  0x13   : > { %p3450_p3 = scmp.ge.s32.totalorder %s4022_s28, 1  ;;  %p407_p4 = scmp.lt.s32.totalorder %s4022_s28, 3 }
  0x14   : > { %p4807_p6 = scmp.eq.s32.totalorder %s4141_s16, 0  ;;  %s4026_s17 = smov [#allocation5]  }
  0x15   : > { %p4147_p7 = pnand %p3450_p3, %p407_p4  ;;  %s419_s18 = sshll.u32 %s4026_s17, 4  ;;  %s4159_s18 = int_to_ptr.vmem [resolvable:$true] %s419_s18 }
  0x16   : > { %s4027_s20 = smov [#allocation10]   ;;  %s4820_s2 = sld [smem:[#allocation18_spill]] }
  0x17   : > { %s4818_s0 = scalar_select %p4147_p7, 1, 0 }
  0x18   : > { %p3772_p8 = pneg %p4147_p7  ;;  %s443_s21 = sshll.u32 %s4027_s20, 4  ;;  %s4161_s21 = int_to_ptr.vmem [resolvable:$true] %s443_s21 }
  0x1a   : > { %p4155_p9 = pnand %p4807_p6, %p3772_p8 }
  0x1c   : > { %s3892_s24 = scalar_lea.hbm %s4820_s2, 128  ;;  %p4171_p11 = pneg %p4155_p9 }
  0x1d   : > { %p3893_p10 = scmp.ne.s32.totalorder %s4820_s2, %s3892_s24  ;;  %p3899_p0 = scmp.lt.u32.totalorder %s3892_s24, %s4820_s2 }
  0x1f   : > { %p3895_p12 = pnand %p4171_p11, %p3893_p10 }
  0x21   : > { %p3896_p13 = pneg %p3895_p12 }
  0x23   : > { %p3901_p1 = pnand %p3899_p0, %p3896_p13 }
  0x25   : > { %3904 = shalt.err (!%p3901_p1)
}
  0x26   : > { %s3905_s20 = scalar_lea.vmem %s434_s30, 128  ;;  %p3913_p8 = scmp.lt.s32.totalorder %s434_s30, %s434_s30 }
  0x27   : > { %p3906_p2 = scmp.ne.s32.totalorder %s434_s30, %s3905_s20  ;;  %p3914_p5 = scmp.lt.s32.totalorder %s3905_s20, %s3905_s20 }
  0x29   : > { %p3908_p3 = pnand %p3906_p2, %p4171_p11  ;;  %p3915_p6 = por %p3914_p5, %p3913_p8 }
  0x2b   : > { %p3909_p4 = pneg %p3908_p3 }
  0x2d   : > { %p3916_p7 = pnand %p3915_p6, %p3909_p4 }
  0x2f   : > { %3919 = shalt.err (!%p3916_p7)
}
  0x30   : > { %3778 = dma.hbm_to_vmem [thread:$0]  (!%p4155_p9), %s4820_s2, 128, %s434_s30, [#allocation9]  }
  0x31   : > { %s4822_s1 = sld [smem:[#allocation17_spill]] }
  0x37   : > { %s3920_s26 = scalar_lea.hbm %s4822_s1, 256 }
  0x38   : > { %p3921_p10 = scmp.ne.s32.totalorder %s4822_s1, %s3920_s26  ;;  %p3927_p6 = scmp.lt.u32.totalorder %s3920_s26, %s4822_s1 }
  0x3a   : > { %p3923_p12 = pnand %p3921_p10, %p4171_p11 }
  0x3c   : > { %p3924_p5 = pneg %p3923_p12 }
  0x3e   : > { %p3929_p7 = pnand %p3927_p6, %p3924_p5 }
  0x40   : > { %3932 = shalt.err (!%p3929_p7)
}
  0x41   : > { %s3933_s30 = scalar_lea.vmem %s4159_s18, 256  ;;  %p3941_p2 = scmp.lt.s32.totalorder %s4159_s18, %s4159_s18 }
  0x42   : > { %p3934_p13 = scmp.ne.s32.totalorder %s4159_s18, %s3933_s30  ;;  %p3942_p3 = scmp.lt.s32.totalorder %s3933_s30, %s3933_s30 }
  0x44   : > { %p3936_p0 = pnand %p3934_p13, %p4171_p11  ;;  %p3943_p4 = por %p3942_p3, %p3941_p2 }
  0x46   : > { %p3937_p1 = pneg %p3936_p0 }
  0x48   : > { %p3944_p8 = pnand %p3943_p4, %p3937_p1 }
  0x4a   : > { %3947 = shalt.err (!%p3944_p8)
}
  0x4b   : > { %s4028_s22 = smov 128   ;;  %s4029_s28 = smov 8  }
  0x4c   : > { %3775 = dma.hbm_to_vmem [thread:$0]  (!%p4155_p9), %s4822_s1, 256, %s4159_s18, [#allocation6], %s4028_s22, %s4028_s22, %s4029_s28  }
  0x4d   : > { %s4823_s3 = sld [smem:[#allocation19_spill]] }
  0x53   : > { %s3948_s29 = scalar_lea.hbm %s4823_s3, 256 }
  0x54   : > { %p3949_p10 = scmp.ne.s32.totalorder %s4823_s3, %s3948_s29  ;;  %p3955_p6 = scmp.lt.u32.totalorder %s3948_s29, %s4823_s3 }
  0x56   : > { %p3951_p12 = pnand %p3949_p10, %p4171_p11 }
  0x58   : > { %p3952_p5 = pneg %p3951_p12 }
  0x5a   : > { %p3957_p7 = pnand %p3955_p6, %p3952_p5 }
  0x5c   : > { %3960 = shalt.err (!%p3957_p7)
}
  0x5d   : > { %s3961_s18 = scalar_lea.vmem %s4161_s21, 256  ;;  %p3969_p2 = scmp.lt.s32.totalorder %s4161_s21, %s4161_s21 }
  0x5e   : > { %p3962_p13 = scmp.ne.s32.totalorder %s4161_s21, %s3961_s18  ;;  %p3970_p3 = scmp.lt.s32.totalorder %s3961_s18, %s3961_s18 }
  0x60   : > { %p3964_p0 = pnand %p3962_p13, %p4171_p11  ;;  %p3971_p4 = por %p3970_p3, %p3969_p2 }
  0x62   : > { %p3965_p1 = pneg %p3964_p0 }
  0x64   : > { %p3972_p8 = pnand %p3971_p4, %p3965_p1 }
  0x66   : > { %3975 = shalt.err (!%p3972_p8)
}
  0x67   : > { %3781 = dma.hbm_to_vmem [thread:$0]  (!%p4155_p9), %s4823_s3, 256, %s4161_s21, [#allocation9], %s4028_s22, %s4028_s22, %s4029_s28  }
  0x68   : > { %p4824_p10 = scmp.ne.s32.totalorder %s4818_s0, 0 }
  0x69   : > { %p4825_p12 = scmp.eq.s32.totalorder (!%p4824_p10), %s4141_s16, 0 }
  0x6a   : > { %537 = sbr.rel (%p4824_p10) target bundleno = 2194 (0x892), region = 76 }
  0x71   : > { %4009 = dma.done.wait (%p4825_p12), [#allocation6], 256   ;;  %p4826_p11 = pmov %p4825_p12 }
  0x73   : > { %4011 = vsyncadd (%p4826_p11), [#allocation6], 4294967040  ;;  %p4827_p5 = pmov %p4826_p11 }
  0x75   : > { %4013 = dma.done.wait (%p4827_p5), [#allocation9], 384   ;;  %p4828_p6 = pmov %p4827_p5 }
  0x76   : > { %p626_p7 = scmp.lt.s32.totalorder %s4141_s16, 1  ;;  %s4829_s4 = sld [smem:[#allocation20_spill]] }
  0x77   : > { %4015 = vsyncadd (%p4828_p6), [#allocation9], 4294966912  ;;  %s4830_s6 = sld [smem:[#allocation21_spill]]  ;;  %s4831_s8 = sld [smem:[#allocation22_spill]] }
  0x78   : > { %s4245_s19 = scalar_select %p626_p7, %s4141_s16, 1 }
  0x79   : > { %s4832_s10 = sld [smem:[#allocation23_spill]]  ;;  %p4833_p9 = scmp.ne.s32.totalorder %s4141_s16, 0 }
  0x7a   : > { %s3549_s0 = sshll.u32 %s4245_s19, 4  ;;  %s3553_s20 = sshll.u32 %s4245_s19, 6  ;;  %v680_v0 = vld [vmem:[#allocation8] sm:$0x1] (!%p4833_p9)  ;;  %vm682_vm0 = vcmask (!%p4833_p9), 253952  }
  0x7b   : > { %s4288_s2 = scalar_lea.vmem %s4803_s12, %s3553_s20  ;;  %s4297_s22 = scalar_lea.vmem %s4805_s14, %s3549_s0  ;;  %v688_v1 = vld [vmem:[#allocation8 + $0x1] sm:$0x1] (!%p4833_p9)  ;;  %v695_v3 = vld [vmem:[#allocation8 + $0x2] sm:$0x1] (!%p4833_p9)  ;;  %v702_v7 = vld [vmem:[#allocation8 + $0x3] sm:$0x1] (!%p4833_p9) }
  0x7c   : > { %s4255_s25 = scalar_lea.vmem %s4829_s4, %s3549_s0  ;;  %675 = sbr.rel (%p4833_p9) target bundleno = 159 (0x9f), region = 92  ;;  %v709_v8 = vld [vmem:[#allocation8 + $0x4] sm:$0x1] (!%p4833_p9)  ;;  %v716_v11 = vld [vmem:[#allocation8 + $0x5] sm:$0x1] (!%p4833_p9) }
  0x7d   : > { %s4260_s17 = scalar_lea.vmem %s4830_s6, %s3549_s0  ;;  %s4269_s1 = scalar_lea.vmem %s4831_s8, %s3549_s0  ;;  %v723_v15 = vld [vmem:[#allocation8 + $0x6] sm:$0x1] (!%p4833_p9)  ;;  %v730_v21 = vld [vmem:[#allocation8 + $0x7] sm:$0x1] (!%p4833_p9)  ;;  %v737_v22 = vld [vmem:[#allocation8] sm:$0x1] (!%p4833_p9) }
  0x7e   : > { %s676_s24 = sld [smem:[#allocation4]] (!%p4833_p9)  ;;  %s3472_s26 = sld [smem:[#allocation4 + $0x1]] (!%p4833_p9)  ;;  %v744_v35 = vld [vmem:[#allocation8 + $0x1] sm:$0x1] (!%p4833_p9)  ;;  %v751_v40 = vld [vmem:[#allocation8 + $0x2] sm:$0x1] (!%p4833_p9) }
  0x7f   : > { %s4278_s3 = scalar_lea.vmem %s4832_s10, %s3549_s0  ;;  %s3473_s29 = sld [smem:[#allocation4 + $0x2]] (!%p4833_p9)  ;;  %v758_v41 = vld [vmem:[#allocation8 + $0x3] sm:$0x1] (!%p4833_p9)  ;;  %v765_v43 = vld [vmem:[#allocation8 + $0x4] sm:$0x1] (!%p4833_p9) }
  0x80   : > { %s3474_s4 = sld [smem:[#allocation4 + $0x3]] (!%p4833_p9)  ;;  %s3475_s8 = sld [smem:[#allocation4 + $0x4]] (!%p4833_p9)  ;;  %v772_v44 = vld [vmem:[#allocation8 + $0x5] sm:$0x1] (!%p4833_p9)  ;;  %v779_v50 = vld [vmem:[#allocation8 + $0x6] sm:$0x1] (!%p4833_p9) }
  0x81   : > { %s4301_s18 = sld [smem:[#allocation4 + $0x5]] (!%p4833_p9)  ;;  %s4303_s20 = sld [smem:[#allocation4 + $0x6]] (!%p4833_p9)  ;;  %v786_v57 = vld [vmem:[#allocation8 + $0x7] sm:$0x1] (!%p4833_p9) }
  0x82   : > { %s4305_s6 = sld [smem:[#allocation4 + $0x7]] (!%p4833_p9)  ;;  %s4307_s30 = sld [smem:[#allocation4 + $0x80]] (!%p4833_p9) }
  0x83   : > { %s4309_s0 = sld [smem:[#allocation4 + $0x81]] }
  0x84   : > { %s677_s28 = scalar_lea.vmem [#allocation5], %s676_s24  ;;  %s685_s23 = scalar_lea.vmem [#allocation5], %s3472_s26 }
  0x85   : > { %v678_v2 = vld [vmem:[%s677_s28] sm:$0x1]  ;;  %s692_s27 = scalar_lea.vmem [#allocation5], %s3473_s29  ;;  %s3482_s29 = sld [smem:[#allocation4 + $0x83]] }
  0x86   : > { %v679_v4 = vmul.f32 5.656854, %v678_v2  ;;  %v686_v5 = vld [vmem:[%s685_s23] sm:$0x1]  ;;  %s699_s21 = scalar_lea.vmem [#allocation5], %s3474_s4  ;;  %s706_s10 = scalar_lea.vmem [#allocation5], %s3475_s8 }
  0x87   : > { %v693_v6 = vld [vmem:[%s692_s27] sm:$0x1]  ;;  %v687_v9 = vmul.f32 5.656854, %v686_v5  ;;  %s713_s24 = scalar_lea.vmem [#allocation5], %s4301_s18  ;;  %s720_s26 = scalar_lea.vmem [#allocation5], %s4303_s20 }
  0x88   : > { %v694_v10 = vmul.f32 5.656854, %v693_v6  ;;  %v681_v12 = vadd.f32 %v680_v0, %v679_v4  ;;  %v700_v13 = vld [vmem:[%s699_s21] sm:$0x1]  ;;  %s727_s4 = scalar_lea.vmem [#allocation5], %s4305_s6  ;;  %s734_s8 = scalar_lea.vmem [#allocation5], %s4307_s30 }
  0x89   : > { %v707_v14 = vld [vmem:[%s706_s10] sm:$0x1]  ;;  %v689_v16 = vadd.f32 %v688_v1, %v687_v9  ;;  %v701_v18 = vmul.f32 5.656854, %v700_v13  ;;  %s741_s10 = scalar_lea.vmem [#allocation5], %s4309_s0  ;;  %s3481_s21 = sld [smem:[#allocation4 + $0x82]] }
  0x8a   : > { %v696_v17 = vadd.f32 %v695_v3, %v694_v10  ;;  %v708_v19 = vmul.f32 5.656854, %v707_v14  ;;  %v714_v20 = vld [vmem:[%s713_s24] sm:$0x1]  ;;  %683 = vst.msk [vmem:[#allocation2] sm:$0x1] %vm682_vm0, %v681_v12 }
  0x8b   : > { %v715_v23 = vmul.f32 5.656854, %v714_v20  ;;  %v721_v24 = vld [vmem:[%s720_s26] sm:$0x1]  ;;  %690 = vst.msk [vmem:[#allocation2 + $0x1] sm:$0x1] %vm682_vm0, %v689_v16  ;;  %v703_v25 = vadd.f32 %v702_v7, %v701_v18 }
  0x8c   : > { %697 = vst.msk [vmem:[#allocation2 + $0x2] sm:$0x1] %vm682_vm0, %v696_v17  ;;  %v710_v26 = vadd.f32 %v709_v8, %v708_v19  ;;  %v722_v27 = vmul.f32 5.656854, %v721_v24  ;;  %v728_v28 = vld [vmem:[%s727_s4] sm:$0x1] }
  0x8d   : > { %v735_v29 = vld [vmem:[%s734_s8] sm:$0x1]  ;;  %v717_v30 = vadd.f32 %v716_v11, %v715_v23  ;;  %v729_v31 = vmul.f32 5.656854, %v728_v28  ;;  %704 = vst.msk [vmem:[#allocation2 + $0x3] sm:$0x1] %vm682_vm0, %v703_v25 }
  0x8e   : > { %v736_v32 = vmul.f32 5.656854, %v735_v29  ;;  %711 = vst.msk [vmem:[#allocation2 + $0x4] sm:$0x1] %vm682_vm0, %v710_v26  ;;  %v724_v33 = vadd.f32 %v723_v15, %v722_v27  ;;  %v742_v34 = vld [vmem:[%s741_s10] sm:$0x1] }
  0x8f   : > { %718 = vst.msk [vmem:[#allocation2 + $0x5] sm:$0x1] %vm682_vm0, %v717_v30  ;;  %v731_v36 = vadd.f32 %v730_v21, %v729_v31  ;;  %v743_v38 = vmul.f32 5.656854, %v742_v34  ;;  %s3483_s18 = sld [smem:[#allocation4 + $0x84]]  ;;  %s3484_s20 = sld [smem:[#allocation4 + $0x85]] }
  0x90   : > { %v738_v37 = vadd.f32 %v737_v22, %v736_v32  ;;  %725 = vst.msk [vmem:[#allocation2 + $0x6] sm:$0x1] %vm682_vm0, %v724_v33  ;;  %s3485_s6 = sld [smem:[#allocation4 + $0x86]]  ;;  %s3486_s30 = sld [smem:[#allocation4 + $0x87]] }
  0x91   : > { %732 = vst.msk [vmem:[#allocation2 + $0x7] sm:$0x1] %vm682_vm0, %v731_v36  ;;  %v745_v39 = vadd.f32 %v744_v35, %v743_v38  ;;  %s748_s0 = scalar_lea.vmem [#allocation5], %s3481_s21  ;;  %s755_s28 = scalar_lea.vmem [#allocation5], %s3482_s29 }
  0x92   : > { %739 = vst.msk [vmem:[#allocation2 + $0x8] sm:$0x1] %vm682_vm0, %v738_v37  ;;  %v749_v42 = vld [vmem:[%s748_s0] sm:$0x1] }
  0x93   : > { %746 = vst.msk [vmem:[#allocation2 + $0x9] sm:$0x1] %vm682_vm0, %v745_v39  ;;  %v750_v45 = vmul.f32 5.656854, %v749_v42  ;;  %v756_v46 = vld [vmem:[%s755_s28] sm:$0x1] }
  0x94   : > { %v757_v47 = vmul.f32 5.656854, %v756_v46 }
  0x95   : > { %s762_s23 = scalar_lea.vmem [#allocation5], %s3483_s18  ;;  %s769_s27 = scalar_lea.vmem [#allocation5], %s3484_s20  ;;  %v752_v51 = vadd.f32 %v751_v40, %v750_v45 }
  0x96   : > { %v763_v48 = vld [vmem:[%s762_s23] sm:$0x1]  ;;  %v759_v54 = vadd.f32 %v758_v41, %v757_v47  ;;  %s776_s24 = scalar_lea.vmem [#allocation5], %s3485_s6  ;;  %s783_s26 = scalar_lea.vmem [#allocation5], %s3486_s30 }
  0x97   : > { %v770_v49 = vld [vmem:[%s769_s27] sm:$0x1]  ;;  %v764_v52 = vmul.f32 5.656854, %v763_v48  ;;  %753 = vst.msk [vmem:[#allocation2 + $0xa] sm:$0x1] %vm682_vm0, %v752_v51 }
  0x98   : > { %v771_v53 = vmul.f32 5.656854, %v770_v49  ;;  %v777_v55 = vld [vmem:[%s776_s24] sm:$0x1]  ;;  %760 = vst.msk [vmem:[#allocation2 + $0xb] sm:$0x1] %vm682_vm0, %v759_v54 }
  0x99   : > { %v784_v56 = vld [vmem:[%s783_s26] sm:$0x1]  ;;  %v766_v58 = vadd.f32 %v765_v43, %v764_v52  ;;  %v778_v60 = vmul.f32 5.656854, %v777_v55 }
  0x9a   : > { %v773_v59 = vadd.f32 %v772_v44, %v771_v53  ;;  %v785_v61 = vmul.f32 5.656854, %v784_v56 }
  0x9b   : > { %767 = vst.msk [vmem:[#allocation2 + $0xc] sm:$0x1] %vm682_vm0, %v766_v58  ;;  %v780_v62 = vadd.f32 %v779_v50, %v778_v60 }
  0x9c   : > { %774 = vst.msk [vmem:[#allocation2 + $0xd] sm:$0x1] %vm682_vm0, %v773_v59  ;;  %v787_v63 = vadd.f32 %v786_v57, %v785_v61 }
  0x9d   : > { %781 = vst.msk [vmem:[#allocation2 + $0xe] sm:$0x1] %vm682_vm0, %v780_v62 }
  0x9e   : > { %788 = vst.msk [vmem:[#allocation2 + $0xf] sm:$0x1] %vm682_vm0, %v787_v63 }
  0x9f PF: > { %v3832_v0 = vld [vmem:[%s4255_s25] sm:$0xff]   ;;  %v4030_v1 = vmov 0.0   ;;  %v3833_v2 = vld [vmem:[%s4255_s25 + $0x8] sm:$0xff]   ;;  %vm4031_vm1 = vmmov 0   ;;  %vm817_vm2 = vcmask 261120   ;;  %v792_v9 = vld [vmem:[#allocation10 + $0x8] sm:$0xff]  ;;  %s4834_s4 = scalar_lea.vmem %s4796_s5, %s4245_s19  ;;  %s4835_s21 = scalar_lea.vmem %s4798_s7, %s4245_s19  ;;  %v957_v29 = vlaneseq }
  0xa0   : > { %3608 = vmatprep.subr.bf16.mxu1 %v4030_v1  ;;  %3636 = vmatprep.subr.bf16.mxu0 %v4030_v1  ;;  %v789_v3 = vld [vmem:[#allocation2] sm:$0xff]  ;;  %v3835_v7 = vld [vmem:[%s4260_s17 + $0x8] sm:$0xff]   ;;  %s4032_s29 = smov 104   ;;  %s4033_s18 = smov 120   ;;  %v4036_v27 = vmov 1983009808  }
  0xa1   : > { %3609 = vmatpush3.bf16.msra.mxu1 %v3832_v0  ;;  %3612 = vmatprep.mubr.msk.bf16.mxu1 %vm4031_vm1, %v4030_v1  ;;  %v3834_v6 = vld [vmem:[%s4260_s17] sm:$0xff]   ;;  %v791_v8 = vld [vmem:[#allocation10] sm:$0xff]  ;;  %s4034_s20 = smov 112   ;;  %s4035_s6 = smov 96   ;;  %v955_v28 = vunpack.c.l.s4 %v4036_v27  ;;  %v4037_v30 = vmov 1934713408  }
  0xa2   : > { %3610 = vmatprep.subr.bf16.mxu1 %v4030_v1  ;;  %3638 = vmatprep.mubr.msk.bf16.mxu0 %vm4031_vm1, %v4030_v1  ;;  %v868_v10 = vpack.c.bf16 %v792_v9, %v791_v8  ;;  %v3487_v15 = vld [vmem:[%s4834_s4] ss:$0 sm:$0xff]  ;;  %v987_v31 = vunpack.c.l.s4 %v4037_v30  ;;  %v958_v33 = vshrl.u32 %v957_v29, 7  ;;  %vm1836_vm3 = vcmask 64512   ;;  %s4038_s30 = smov 16   ;;  %s4039_s0 = smov 8  }
  0xa3   : > { %v3491_v16 = vld [vmem:[%s4835_s21] ss:$0 sm:$0xff]  ;;  %v956_v32 = vunpack.c.0.s8 %v955_v28  ;;  %vm2312_vm4 = vcmask 1043456   ;;  %s4040_s28 = smov 24   ;;  %vm2976_vm5 = vcmask 130048   ;;  %vm2979_vm6 = vcmask 195584   ;;  %s4836_s23 = scalar_lea.vmem %s4800_s9, %s4245_s19 }
  0xa4   : > { %v988_v36 = vunpack.c.0.s8 %v987_v31  ;;  %s4837_s26 = scalar_lea.vmem %s4802_s11, %s4245_s19  ;;  %s4838_s17 = scalar_lea.vmem %s4804_s13, %s4245_s19 }
  0xa5   : > { %v790_v4 = vld [vmem:[#allocation2 + $0x8] sm:$0xff]  ;;  %3611 = vmatpush3.bf16.msra.mxu1 %v3833_v2  ;;  %v4377_v37 = vsub.s32 %v956_v32, %v958_v33  ;;  %p3544_p13 = scmp.ne.s32.totalorder %s4141_s16, 1 }
  0xa6   : > { %v797_v5 = vpack.c.bf16 %v790_v4, %v789_v3  ;;  %3616 = vmatprep.subr.bf16.mxu1 %v4030_v1  ;;  %v4387_v44 = vsub.s32 %v988_v36, %v958_v33 }
  0xa8   : > { %3613 = vmatmul.mubr.msk.bf16.vlgmr.msra.gmra.mrb[0].mxu1 %vm817_vm2, %v797_v5 }
  0xa9   : > { %3617 = vmatpush3.bf16.msra.mxu1 %v3834_v6  ;;  %3620 = vmatprep.mubr.msk.bf16.mxu1 %vm4031_vm1, %v4030_v1 }
  0xaa   : > { %3618 = vmatprep.subr.bf16.mxu1 %v4030_v1 }
  0xad   : > { %3619 = vmatpush3.bf16.msra.mxu1 %v3835_v7 }
  0xae   : > { %3624 = vmatprep.subr.bf16.mxu1 %v4030_v1 }
  0xb0   : > { %3621 = vmatmul.mubr.msk.bf16.vlgmr.msra.gmra.mrb[4].mxu1 %vm817_vm2, %v868_v10 }
  0xb1   : > { %3626 = vmatprep.mubr.msk.bf16.mxu1 %vm4031_vm1, %v4030_v1 }
 0x17b   : > { %v855_v11 = vpop.f32.mrb[0].mxu1 }
 0x17c   : > { %v3614_v12 = vpop.f32.mrb[1].mxu1  ;;  %v856_v18 = vadd.f32 %v3487_v15, %v855_v11 }
 0x17d   : > { %v858_v13 = vpop.f32.mrb[2].mxu1 }
 0x17e   : > { %v3615_v14 = vpop.f32.mrb[3].mxu1  ;;  %v862_v23 = vmul.f32 0.35355338, %v856_v18  ;;  %v859_v24 = vadd.f32 %v3487_v15, %v858_v13 }
 0x180   : > { %v4366_v26 = vmul.f32 0.35355338, %v859_v24 }
 0x183   : > { %v925_v17 = vpop.f32.mrb[4].mxu1 }
 0x184   : > { %v926_v19 = vadd.f32 %v3491_v16, %v925_v17  ;;  %v3622_v20 = vpop.f32.mrb[5].mxu1 }
 0x185   : > { %v928_v21 = vpop.f32.mrb[6].mxu1 }
 0x186   : > { %1246 = vrot.lane.b32.xlu1 %v926_v19, %s4032_s29  ;;  %1234 = vrot.lane.b32.xlu0 %v926_v19, %s4033_s18  ;;  %v3623_v22 = vpop.f32.mrb[7].mxu1  ;;  %v4362_v25 = vadd.f32 %v3491_v16, %v928_v21 }
 0x18a   : > { %934 = vrot.lane.b32.xlu1 %v862_v23, %s4033_s18  ;;  %1240 = vrot.lane.b32.xlu0 %v926_v19, %s4034_s20 }
 0x18e   : > { %946 = vrot.lane.b32.xlu1 %v862_v23, %s4032_s29  ;;  %940 = vrot.lane.b32.xlu0 %v862_v23, %s4034_s20 }
 0x192   : > { %1242 = vrot.lane.b32.xlu1 %v4362_v25, %s4034_s20  ;;  %1236 = vrot.lane.b32.xlu0 %v4362_v25, %s4033_s18 }
 0x196   : > { %936 = vrot.lane.b32.xlu1 %v4366_v26, %s4033_s18  ;;  %1248 = vrot.lane.b32.xlu0 %v4362_v25, %s4032_s29 }
 0x19a   : > { %948 = vrot.lane.b32.xlu1 %v4366_v26, %s4032_s29  ;;  %942 = vrot.lane.b32.xlu0 %v4366_v26, %s4034_s20 }
 0x19e   : > { %1532 = vrot.lane.b32.xlu1 %v926_v19, %s4035_s6 }
 0x1f8   : > { %v4373_v34 = vpop.permute.xlu1 %1246  ;;  %v4375_v35 = vpop.permute.xlu0 %1234 }
 0x1f9   : > { %v1268_v38 = vcombine.low %v4375_v35, %v4373_v34  ;;  %v1269_v39 = vcombine.high %v4375_v35, %v4373_v34 }
 0x1fb   : > { %v1276_v45 = vrot.slane %v1268_v38, %v4377_v37  ;;  %v1283_v46 = vrot.slane %v1269_v39, %v4377_v37 }
 0x1fc   : > { %v935_v40 = vpop.permute.xlu1 %934  ;;  %v4383_v41 = vpop.permute.xlu0 %1240 }
 0x1fd   : > { %v1252_v42 = vcombine.low %v926_v19, %v4383_v41  ;;  %v1253_v43 = vcombine.high %v926_v19, %v4383_v41 }
 0x1ff   : > { %v1260_v47 = vrot.slane %v1252_v42, %v4377_v37  ;;  %v1267_v48 = vrot.slane %v1253_v43, %v4377_v37 }
 0x200   : > { %v947_v49 = vpop.permute.xlu1 %946  ;;  %v941_v50 = vpop.permute.xlu0 %940 }
 0x201   : > { %v1284_v51 = vcombine.low %v1260_v47, %v1276_v45  ;;  %v1285_v52 = vcombine.high %v1260_v47, %v1276_v45  ;;  %v1300_v53 = vcombine.low %v1267_v48, %v1283_v46  ;;  %v1301_v54 = vcombine.high %v1267_v48, %v1283_v46 }
 0x202   : > { %v968_v55 = vcombine.low %v935_v40, %v947_v49  ;;  %v969_v56 = vcombine.high %v935_v40, %v947_v49  ;;  %v952_v57 = vcombine.low %v862_v23, %v941_v50  ;;  %v953_v58 = vcombine.high %v862_v23, %v941_v50 }
 0x203   : > { %v1292_v59 = vrot.slane %v1284_v51, %v4387_v44  ;;  %v1299_v60 = vrot.slane %v1285_v52, %v4387_v44  ;;  %v1308_v4 = vrot.slane %v1300_v53, %v4387_v44  ;;  %v1315_v5 = vrot.slane %v1301_v54, %v4387_v44 }
 0x204   : > { %v976_v61 = vrot.slane %v968_v55, %v4377_v37  ;;  %v983_v62 = vrot.slane %v969_v56, %v4377_v37  ;;  %v960_v63 = vrot.slane %v952_v57, %v4377_v37  ;;  %v967_v0 = vrot.slane %v953_v58, %v4377_v37  ;;  %v4399_v2 = vpop.permute.xlu1 %1242  ;;  %v4401_v3 = vpop.permute.xlu0 %1236 }
 0x205   : > { %v1388_v10 = vcombine.low %v1292_v59, %v1299_v60  ;;  %v3499_v11 = vcombine.high %v1292_v59, %v1299_v60  ;;  %v1320_v12 = vcombine.low %v4362_v25, %v4399_v2  ;;  %v1321_v13 = vcombine.high %v4362_v25, %v4399_v2 }
 0x206   : > { %v984_v6 = vcombine.low %v960_v63, %v976_v61  ;;  %v985_v7 = vcombine.high %v960_v63, %v976_v61  ;;  %v1000_v8 = vcombine.low %v967_v0, %v983_v62  ;;  %v1001_v9 = vcombine.high %v967_v0, %v983_v62 }
 0x207   : > { %v1404_v20 = vcombine.low %v1308_v4, %v1315_v5  ;;  %v3500_v21 = vcombine.high %v1308_v4, %v1315_v5  ;;  %v1328_v30 = vrot.slane %v1320_v12, %v4377_v37  ;;  %v1395_v33 = vrot.slane %v1388_v10, %v4377_v37 }
 0x208   : > { %v992_v14 = vrot.slane %v984_v6, %v4387_v44  ;;  %v999_v15 = vrot.slane %v985_v7, %v4387_v44  ;;  %v1008_v16 = vrot.slane %v1000_v8, %v4387_v44  ;;  %v1015_v17 = vrot.slane %v1001_v9, %v4387_v44  ;;  %v937_v18 = vpop.permute.xlu1 %936  ;;  %v4413_v19 = vpop.permute.xlu0 %1248 }
 0x209   : > { %v1336_v22 = vcombine.low %v4401_v3, %v4413_v19  ;;  %v1337_v23 = vcombine.high %v4401_v3, %v4413_v19  ;;  %v1335_v39 = vrot.slane %v1321_v13, %v4377_v37  ;;  %v1403_v42 = vrot.slane %v3499_v11, %v4377_v37 }
 0x20a   : > { %v1088_v24 = vcombine.low %v992_v14, %v999_v15  ;;  %v3495_v27 = vcombine.high %v992_v14, %v999_v15  ;;  %v1104_v28 = vcombine.low %v1008_v16, %v1015_v17  ;;  %v3496_v29 = vcombine.high %v1008_v16, %v1015_v17 }
 0x20b   : > { %v1344_v31 = vrot.slane %v1336_v22, %v4377_v37  ;;  %v1351_v32 = vrot.slane %v1337_v23, %v4377_v37  ;;  %v1411_v51 = vrot.slane %v1404_v20, %v4377_v37  ;;  %v1419_v52 = vrot.slane %v3500_v21, %v4377_v37 }
 0x20c   : > { %v1095_v36 = vrot.slane %v1088_v24, %v4377_v37  ;;  %v1103_v38 = vrot.slane %v3495_v27, %v4377_v37  ;;  %v949_v40 = vpop.permute.xlu1 %948  ;;  %v4428_v43 = vrot.slane %v1104_v28, %v4377_v37  ;;  %v4431_v45 = vrot.slane %v3496_v29, %v4377_v37  ;;  %v943_v48 = vpop.permute.xlu0 %942 }
 0x20d   : > { %v1352_v46 = vcombine.low %v1328_v30, %v1344_v31  ;;  %v1353_v47 = vcombine.high %v1328_v30, %v1344_v31  ;;  %v1036_v49 = vcombine.low %v937_v18, %v949_v40  ;;  %v1037_v50 = vcombine.high %v937_v18, %v949_v40 }
 0x20e   : > { %v1368_v53 = vcombine.low %v1335_v39, %v1351_v32  ;;  %v1369_v54 = vcombine.high %v1335_v39, %v1351_v32  ;;  %v1020_v57 = vcombine.low %v4366_v26, %v943_v48  ;;  %v1021_v58 = vcombine.high %v4366_v26, %v943_v48 }
 0x20f   : > { %v1044_v55 = vrot.slane %v1036_v49, %v4377_v37  ;;  %v1051_v56 = vrot.slane %v1037_v50, %v4377_v37  ;;  %v1120_v59 = vcombine.low %v1095_v36, %v1103_v38  ;;  %v1136_v60 = vcombine.low %v4428_v43, %v4431_v45 }
 0x210   : > { %v1360_v61 = vrot.slane %v1352_v46, %v4387_v44  ;;  %v1367_v62 = vrot.slane %v1353_v47, %v4387_v44  ;;  %v1028_v63 = vrot.slane %v1020_v57, %v4377_v37  ;;  %v1035_v0 = vrot.slane %v1021_v58, %v4377_v37 }
 0x211   : > { %v1420_v4 = vcombine.low %v1395_v33, %v1403_v42  ;;  %v1436_v5 = vcombine.low %v1411_v51, %v1419_v52  ;;  %v1376_v6 = vrot.slane %v1368_v53, %v4387_v44  ;;  %v1383_v7 = vrot.slane %v1369_v54, %v4387_v44 }
 0x212   : > { %v1421_v26 = vcombine.high %v1395_v33, %v1403_v42  ;;  %v1437_v8 = vcombine.high %v1411_v51, %v1419_v52  ;;  %v1052_v9 = vcombine.low %v1028_v63, %v1044_v55  ;;  %v1053_v10 = vcombine.high %v1028_v63, %v1044_v55 }
 0x213   : > { %v1068_v11 = vcombine.low %v1035_v0, %v1051_v56  ;;  %v1069_v12 = vcombine.high %v1035_v0, %v1051_v56  ;;  %v1428_v13 = vrot.slane %v1420_v4, %v4387_v44  ;;  %v1444_v14 = vrot.slane %v1436_v5, %v4387_v44 }
 0x214   : > { %v1435_v15 = vrot.slane %v1421_v26, %v4387_v44  ;;  %v1451_v16 = vrot.slane %v1437_v8, %v4387_v44  ;;  %v1060_v17 = vrot.slane %v1052_v9, %v4387_v44  ;;  %v1067_v18 = vrot.slane %v1053_v10, %v4387_v44 }
 0x215   : > { %v1076_v20 = vrot.slane %v1068_v11, %v4387_v44  ;;  %v1083_v21 = vrot.slane %v1069_v12, %v4387_v44  ;;  %v1452_v22 = vcombine.low %v1428_v13, %v1444_v14  ;;  %v1128_v24 = vrot.slane %v1120_v59, %v4387_v44 }
 0x216   : > { %v1454_v23 = vcombine.low %v1435_v15, %v1451_v16  ;;  %v1121_v27 = vcombine.high %v1095_v36, %v1103_v38  ;;  %v1156_v28 = vcombine.low %v1060_v17, %v1067_v18  ;;  %v3497_v29 = vcombine.high %v1060_v17, %v1067_v18 }
 0x217   : > { %v1172_v30 = vcombine.low %v1076_v20, %v1083_v21  ;;  %v1144_v31 = vrot.slane %v1136_v60, %v4387_v44  ;;  %v1456_v32 = vcombine.low %v1360_v61, %v1367_v62  ;;  %v3498_v33 = vcombine.high %v1076_v20, %v1083_v21 }
 0x218   : > { %v1524_v39 = vpack.c.bf16 %v1452_v22, %v1452_v22  ;;  %v1526_v40 = vpack.c.bf16 %v1454_v23, %v1454_v23  ;;  %v3501_v42 = vcombine.high %v1360_v61, %v1367_v62  ;;  %v1472_v46 = vcombine.low %v1376_v6, %v1383_v7 }
 0x219   : > { %v3502_v47 = vcombine.high %v1376_v6, %v1383_v7  ;;  %v1135_v48 = vrot.slane %v1121_v27, %v4387_v44  ;;  %v1137_v36 = vcombine.high %v4428_v43, %v4431_v45  ;;  %v1453_v38 = vcombine.high %v1428_v13, %v1444_v14 }
 0x21a   : > { %v1841_v49 = vsel %vm1836_vm3, %v1524_v39, 0  ;;  %v1933_v50 = vsel %vm1836_vm3, %v1526_v40, 0  ;;  %v1163_v51 = vrot.slane %v1156_v28, %v4377_v37  ;;  %v1171_v52 = vrot.slane %v3497_v29, %v4377_v37 }
 0x21b   : > { %v1179_v53 = vrot.slane %v1172_v30, %v4377_v37  ;;  %3625 = vmatpush3.bf16.xpose.msra.mxu1 %v1841_v49  ;;  %v1152_v54 = vcombine.low %v1128_v24, %v1144_v31  ;;  %v1187_v55 = vrot.slane %v3498_v33, %v4377_v37  ;;  %3637 = vmatpush3.bf16.xpose.msra.mxu0 %v1933_v50 }
 0x21c   : > { %3630 = vmatprep.subr.bf16.mxu1 %v4030_v1  ;;  %v1151_v56 = vrot.slane %v1137_v36, %v4387_v44  ;;  %v1463_v57 = vrot.slane %v1456_v32, %v4377_v37  ;;  %3648 = vmatprep.subr.bf16.mxu0 %v4030_v1  ;;  %v1471_v43 = vrot.slane %v3501_v42, %v4377_v37 }
 0x21d   : > { %v1479_v45 = vrot.slane %v1472_v46, %v4377_v37  ;;  %v1487_v58 = vrot.slane %v3502_v47, %v4377_v37  ;;  %v1525_v60 = vpack.c.bf16 %v1453_v38, %v1453_v38  ;;  %v1188_v63 = vcombine.low %v1163_v51, %v1171_v52 }
 0x21e   : > { %v1154_v59 = vcombine.low %v1135_v48, %v1151_v56  ;;  %v1488_v61 = vcombine.low %v1463_v57, %v1471_v43  ;;  %v1204_v0 = vcombine.low %v1179_v53, %v1187_v55  ;;  %v1224_v4 = vpack.c.bf16 %v1152_v54, %v1152_v54 }
 0x21f   : > { %v1504_v62 = vcombine.low %v1479_v45, %v1487_v58  ;;  %v1489_v5 = vcombine.high %v1463_v57, %v1471_v43  ;;  %v1505_v8 = vcombine.high %v1479_v45, %v1487_v58  ;;  %v1887_v9 = vsel %vm1836_vm3, %v1525_v60, 0 }
 0x220   : > { %v1226_v6 = vpack.c.bf16 %v1154_v59, %v1154_v59  ;;  %v1496_v7 = vrot.slane %v1488_v61, %v4387_v44  ;;  %v1455_v10 = vcombine.high %v1435_v15, %v1451_v16  ;;  %v1153_v14 = vcombine.high %v1128_v24, %v1144_v31 }
 0x221   : > { %v1512_v26 = vrot.slane %v1504_v62, %v4387_v44  ;;  %v1503_v12 = vrot.slane %v1489_v5, %v4387_v44  ;;  %v1519_v13 = vrot.slane %v1505_v8, %v4387_v44  ;;  %v1196_v15 = vrot.slane %v1188_v63, %v4387_v44 }
 0x222   : > { %3627 = vmatmul.mubr.msk.bf16.vlgmr.msra.gmra.mrb[8].mxu1 %vm1836_vm3, %v1224_v4  ;;  %3639 = vmatmul.mubr.msk.bf16.vlgmr.msra.gmra.mrb[0].mxu0 %vm1836_vm3, %v1226_v6  ;;  %v1212_v16 = vrot.slane %v1204_v0, %v4387_v44  ;;  %v1527_v18 = vpack.c.bf16 %v1455_v10, %v1455_v10  ;;  %v1225_v22 = vpack.c.bf16 %v1153_v14, %v1153_v14 }
 0x223   : > { %3631 = vmatpush3.bf16.xpose.msra.mxu1 %v1887_v9  ;;  %v1520_v11 = vcombine.low %v1496_v7, %v1512_v26  ;;  %3632 = vmatprep.mubr.msk.bf16.mxu1 %vm4031_vm1, %v4030_v1  ;;  %v1522_v21 = vcombine.low %v1503_v12, %v1519_v13  ;;  %v1189_v23 = vcombine.high %v1163_v51, %v1171_v52 }
 0x224   : > { %3642 = vmatprep.subr.bf16.mxu1 %v4030_v1  ;;  %3650 = vmatprep.mubr.msk.bf16.mxu0 %vm4031_vm1, %v4030_v1  ;;  %v1205_v27 = vcombine.high %v1179_v53, %v1187_v55  ;;  %v1220_v28 = vcombine.low %v1196_v15, %v1212_v16  ;;  %v1979_v24 = vsel %vm1836_vm3, %v1527_v18, 0  ;;  %v1521_v29 = vcombine.high %v1496_v7, %v1512_v26 }
 0x225   : > { %v1528_v17 = vpack.c.bf16 %v1520_v11, %v1520_v11  ;;  %v1530_v30 = vpack.c.bf16 %v1522_v21, %v1522_v21  ;;  %v1155_v31 = vcombine.high %v1135_v48, %v1151_v56  ;;  %v1203_v33 = vrot.slane %v1189_v23, %v4387_v44 }
 0x226   : > { %v1228_v32 = vpack.c.bf16 %v1220_v28, %v1220_v28  ;;  %v1219_v39 = vrot.slane %v1205_v27, %v4387_v44  ;;  %v1529_v40 = vpack.c.bf16 %v1521_v29, %v1521_v29  ;;  %v1523_v49 = vcombine.high %v1503_v12, %v1519_v13 }
 0x227   : > { %v2025_v20 = vsel %vm1836_vm3, %v1528_v17, 0  ;;  %v2117_v42 = vsel %vm1836_vm3, %v1530_v30, 0  ;;  %v1227_v46 = vpack.c.bf16 %v1155_v31, %v1155_v31  ;;  %v1221_v50 = vcombine.high %v1196_v15, %v1212_v16 }
 0x228   : > { %3649 = vmatpush3.bf16.xpose.msra.mxu0 %v2025_v20  ;;  %v1222_v47 = vcombine.low %v1203_v33, %v1219_v39  ;;  %v2071_v48 = vsel %vm1836_vm3, %v1529_v40, 0  ;;  %v1531_v38 = vpack.c.bf16 %v1523_v49, %v1523_v49  ;;  %v1223_v53 = vcombine.high %v1203_v33, %v1219_v39 }
 0x229   : > { %3660 = vmatprep.subr.bf16.mxu0 %v4030_v1  ;;  %v1229_v51 = vpack.c.bf16 %v1221_v50, %v1221_v50 }
 0x22a   : > { %3633 = vmatmul.mubr.msk.bf16.vlgmr.msra.gmra.mrb[12].mxu1 %vm1836_vm3, %v1225_v22  ;;  %v1230_v36 = vpack.c.bf16 %v1222_v47, %v1222_v47  ;;  %v2163_v52 = vsel %vm1836_vm3, %v1531_v38, 0  ;;  %v1231_v54 = vpack.c.bf16 %v1223_v53, %v1223_v53 }
 0x22b   : > { %3643 = vmatpush3.bf16.xpose.msra.mxu1 %v1979_v24  ;;  %3644 = vmatprep.mubr.msk.bf16.mxu1 %vm4031_vm1, %v4030_v1 }
 0x22c   : > { %3654 = vmatprep.subr.bf16.mxu1 %v4030_v1 }
 0x22f   : > { %3651 = vmatmul.mubr.msk.bf16.vlgmr.msra.gmra.mrb[4].mxu0 %vm1836_vm3, %v1228_v32 }
 0x230   : > { %3661 = vmatpush3.bf16.xpose.msra.mxu0 %v2117_v42  ;;  %3662 = vmatprep.mubr.msk.bf16.mxu0 %vm4031_vm1, %v4030_v1 }
 0x231   : > { %3672 = vmatprep.subr.bf16.mxu0 %v4030_v1 }
 0x232   : > { %3645 = vmatmul.mubr.msk.bf16.vlgmr.msra.gmra.mrb[16].mxu1 %vm1836_vm3, %v1227_v46  ;;  %v1533_v46 = vpop.permute.xlu1 %1532 }
 0x233   : > { %3655 = vmatpush3.bf16.xpose.msra.mxu1 %v2071_v48  ;;  %3656 = vmatprep.mubr.msk.bf16.mxu1 %vm4031_vm1, %v4030_v1 }
 0x234   : > { %3666 = vmatprep.subr.bf16.mxu1 %v4030_v1 }
 0x237   : > { %3663 = vmatmul.mubr.msk.bf16.vlgmr.msra.gmra.mrb[8].mxu0 %vm1836_vm3, %v1230_v36 }
 0x238   : > { %3674 = vmatprep.mubr.msk.bf16.mxu0 %vm4031_vm1, %v4030_v1 }
 0x23a   : > { %3657 = vmatmul.mubr.msk.bf16.vlgmr.msra.gmra.mrb[20].mxu1 %vm1836_vm3, %v1229_v51 }
 0x23b   : > { %3667 = vmatpush3.bf16.xpose.msra.mxu1 %v2163_v52  ;;  %3668 = vmatprep.mubr.msk.bf16.mxu1 %vm4031_vm1, %v4030_v1 }
 0x23c   : > { %3678 = vmatprep.subr.bf16.mxu1 %v4030_v1 }
 0x242   : > { %3669 = vmatmul.mubr.msk.bf16.vlgmr.msra.gmra.mrb[24].mxu1 %vm1836_vm3, %v1231_v54 }
 0x243   : > { %3680 = vmatprep.mubr.msk.bf16.mxu1 %vm4031_vm1, %v4030_v1 }
 0x2f5   : > { %v1877_v55 = vpop.f32.mrb[8].mxu1  ;;  %v1969_v56 = vpop.f32.mrb[0].mxu0 }
 0x2f6   : > { %v3628_v57 = vpop.f32.mrb[9].mxu1  ;;  %v2205_v43 = vsel %vm1836_vm3, %v1877_v55, -inf  ;;  %v3640_v45 = vpop.f32.mrb[1].mxu0  ;;  %v2211_v62 = vsel %vm1836_vm3, %v1969_v56, -inf }
 0x2f7   : > { %2206 = vmax.xlane.f32.xlu0 %v2205_v43  ;;  %v1880_v58 = vpop.f32.mrb[10].mxu1  ;;  %v1972_v59 = vpop.f32.mrb[2].mxu0 }
 0x2f8   : > { %v3629_v60 = vpop.f32.mrb[11].mxu1  ;;  %v3641_v61 = vpop.f32.mrb[3].mxu0 }
 0x2fb   : > { %2212 = vmax.xlane.f32.xlu0 %v2211_v62 }
 0x2fd   : > { %v1923_v63 = vpop.f32.mrb[12].mxu1 }
 0x2fe   : > { %v3634_v0 = vpop.f32.mrb[13].mxu1  ;;  %v2208_v4 = vsel %vm1836_vm3, %v1923_v63, -inf }
 0x2ff   : > { %2209 = vmax.xlane.f32.xlu1 %v2208_v4  ;;  %v1926_v5 = vpop.f32.mrb[14].mxu1 }
 0x300   : > { %v3635_v6 = vpop.f32.mrb[15].mxu1 }
 0x302   : > { %v2061_v7 = vpop.f32.mrb[4].mxu0 }
 0x303   : > { %v3652_v26 = vpop.f32.mrb[5].mxu0  ;;  %v2217_v8 = vsel %vm1836_vm3, %v2061_v7, -inf }
 0x304   : > { %v2064_v9 = vpop.f32.mrb[6].mxu0  ;;  %2218 = vmax.xlane.f32.xlu1 %v2217_v8 }
 0x305   : > { %v3653_v10 = vpop.f32.mrb[7].mxu0  ;;  %v2015_v11 = vpop.f32.mrb[16].mxu1 }
 0x306   : > { %v3646_v12 = vpop.f32.mrb[17].mxu1  ;;  %v2214_v13 = vsel %vm1836_vm3, %v2015_v11, -inf }
 0x307   : > { %2215 = vmax.xlane.f32.xlu0 %v2214_v13  ;;  %v2018_v14 = vpop.f32.mrb[18].mxu1 }
 0x308   : > { %v3647_v17 = vpop.f32.mrb[19].mxu1 }
 0x30a   : > { %v4522_v15 = vpop.f32.mrb[8].mxu0 }
 0x30b   : > { %v3664_v16 = vpop.f32.mrb[9].mxu0  ;;  %v2223_v18 = vsel %vm1836_vm3, %v4522_v15, -inf }
 0x30c   : > { %v2156_v20 = vpop.f32.mrb[10].mxu0  ;;  %2224 = vmax.xlane.f32.xlu1 %v2223_v18 }
 0x30d   : > { %v3665_v21 = vpop.f32.mrb[11].mxu0  ;;  %v2107_v22 = vpop.f32.mrb[20].mxu1 }
 0x30e   : > { %v3658_v23 = vpop.f32.mrb[21].mxu1  ;;  %v2220_v27 = vsel %vm1836_vm3, %v2107_v22, -inf }
 0x30f   : > { %2221 = vmax.xlane.f32.xlu0 %v2220_v27  ;;  %v2110_v28 = vpop.f32.mrb[22].mxu1 }
 0x310   : > { %v3659_v24 = vpop.f32.mrb[23].mxu1 }
 0x315   : > { %v4527_v29 = vpop.f32.mrb[24].mxu1 }
 0x316   : > { %v3670_v30 = vpop.f32.mrb[25].mxu1  ;;  %v2226_v31 = vsel %vm1836_vm3, %v4527_v29, -inf }
 0x317   : > { %2227 = vmax.xlane.f32.xlu0 %v2226_v31  ;;  %v2202_v32 = vpop.f32.mrb[26].mxu1 }
 0x318   : > { %v3671_v33 = vpop.f32.mrb[27].mxu1 }
 0x31d   : > { %1540 = vrot.lane.b32.xlu1 %v4383_v41, %s4035_s6 }
 0x321   : > { %1544 = vrot.lane.b32.xlu1 %v4373_v34, %s4035_s6 }
 0x325   : > { %1534 = vrot.lane.b32.xlu1 %v4362_v25, %s4035_s6 }
 0x32d   : > { %1536 = vrot.lane.b32.xlu0 %v4375_v35, %s4035_s6 }
 0x384   : > { %v2207_v39 = vpop.xlane.xlu0 %2206 }
 0x385   : > { %v2229_v40 = vsub.f32 %v1877_v55, %v2207_v39 }
 0x387   : > { %v2237_v42 = vmul.f32 1.442695, %v2229_v40 }
 0x388   : > { %v2213_v47 = vpop.xlane.xlu0 %2212 }
 0x389   : > { %3848 = vpow2.f32 %v2237_v42  ;;  %v2231_v48 = vsub.f32 %v1969_v56, %v2213_v47 }
 0x38b   : > { %v2241_v49 = vmul.f32 1.442695, %v2231_v48 }
 0x38c   : > { %v2210_v50 = vpop.xlane.xlu1 %2209 }
 0x38d   : > { %3850 = vpow2.f32 %v2241_v49  ;;  %v2230_v41 = vsub.f32 %v1923_v63, %v2210_v50 }
 0x38f   : > { %v2239_v36 = vmul.f32 1.442695, %v2230_v41 }
 0x391   : > { %3852 = vpow2.f32 %v2239_v36  ;;  %v2219_v34 = vpop.xlane.xlu1 %2218 }
 0x392   : > { %v2233_v38 = vsub.f32 %v2061_v7, %v2219_v34 }
 0x393   : > { %v4539_v51 = vpop.eup %3848 }
 0x394   : > { %v2245_v25 = vmul.f32 1.442695, %v2233_v38  ;;  %v2216_v52 = vpop.xlane.xlu0 %2215  ;;  %v2253_v35 = vsel %vm1836_vm3, %v4539_v51, 0.0 }
 0x395   : > { %v2232_v53 = vsub.f32 %v2015_v11, %v2216_v52  ;;  %2254 = vadd.xlane.f32.xlu1 %v2253_v35 }
 0x396   : > { %3854 = vpow2.f32 %v2245_v25 }
 0x397   : > { %v4543_v54 = vpop.eup %3850  ;;  %v2243_v55 = vmul.f32 1.442695, %v2232_v53 }
 0x398   : > { %v2259_v56 = vsel %vm1836_vm3, %v4543_v54, 0.0 }
 0x399   : > { %3856 = vpow2.f32 %v2243_v55  ;;  %2260 = vadd.xlane.f32.xlu0 %v2259_v56  ;;  %v4549_v43 = vpop.xlane.xlu1 %2224 }
 0x39b   : > { %v4547_v57 = vpop.eup %3852 }
 0x39c   : > { %v2222_v45 = vpop.xlane.xlu0 %2221  ;;  %v2256_v58 = vsel %vm1836_vm3, %v4547_v57, 0.0 }
 0x39d   : > { %v2234_v59 = vsub.f32 %v2107_v22, %v2222_v45  ;;  %2257 = vadd.xlane.f32.xlu0 %v2256_v58  ;;  %v1541_v63 = vpop.permute.xlu1 %1540 }
 0x39e   : > { %v1556_v6 = vcombine.low %v1533_v46, %v1541_v63  ;;  %v1557_v7 = vcombine.high %v1533_v46, %v1541_v63 }
 0x39f   : > { %v2247_v60 = vmul.f32 1.442695, %v2234_v59 }
 0x3a0   : > { %v4553_v61 = vpop.eup %3854  ;;  %v1564_v12 = vrot.slane %v1556_v6, %v4377_v37  ;;  %v1571_v13 = vrot.slane %v1557_v7, %v4377_v37 }
 0x3a1   : > { %3858 = vpow2.f32 %v2247_v60  ;;  %v2265_v62 = vsel %vm1836_vm3, %v4553_v61, 0.0  ;;  %v1545_v26 = vpop.permute.xlu1 %1544 }
 0x3a2   : > { %2266 = vadd.xlane.f32.xlu0 %v2265_v62 }
 0x3a3   : > { %v4557_v0 = vpop.eup %3856 }
 0x3a4   : > { %v2228_v4 = vpop.xlane.xlu0 %2227  ;;  %v2262_v5 = vsel %vm1836_vm3, %v4557_v0, 0.0 }
 0x3a5   : > { %2263 = vadd.xlane.f32.xlu1 %v2262_v5  ;;  %v2236_v58 = vsub.f32 %v4527_v29, %v2228_v4  ;;  %v1535_v29 = vpop.permute.xlu1 %1534 }
 0x3a7   : > { %v2251_v59 = vmul.f32 1.442695, %v2236_v58 }
 0x3a8   : > { %v1537_v8 = vpop.permute.xlu0 %1536 }
 0x3a9   : > { %v1572_v9 = vcombine.low %v1537_v8, %v1545_v26  ;;  %v1573_v10 = vcombine.high %v1537_v8, %v1545_v26  ;;  %3860 = vpow2.f32 %v2251_v59 }
 0x3ab   : > { %v4561_v11 = vpop.eup %3858  ;;  %v1580_v14 = vrot.slane %v1572_v9, %v4377_v37  ;;  %v1587_v17 = vrot.slane %v1573_v10, %v4377_v37 }
 0x3ac   : > { %v2268_v16 = vsel %vm1836_vm3, %v4561_v11, 0.0 }
 0x3ad   : > { %v1588_v18 = vcombine.low %v1564_v12, %v1580_v14  ;;  %v1589_v20 = vcombine.high %v1564_v12, %v1580_v14  ;;  %v1604_v21 = vcombine.low %v1571_v13, %v1587_v17  ;;  %v1605_v22 = vcombine.high %v1571_v13, %v1587_v17  ;;  %2269 = vadd.xlane.f32.xlu0 %v2268_v16 }
 0x3af   : > { %v1596_v23 = vrot.slane %v1588_v18, %v4387_v44  ;;  %v1603_v27 = vrot.slane %v1589_v20, %v4387_v44  ;;  %v1612_v28 = vrot.slane %v1604_v21, %v4387_v44  ;;  %v1619_v24 = vrot.slane %v1605_v22, %v4387_v44 }
 0x3b1   : > { %v1692_v30 = vcombine.low %v1596_v23, %v1603_v27  ;;  %v3503_v31 = vcombine.high %v1596_v23, %v1603_v27  ;;  %v1708_v32 = vcombine.low %v1612_v28, %v1619_v24  ;;  %v3504_v33 = vcombine.high %v1612_v28, %v1619_v24 }
 0x3b3   : > { %v1699_v39 = vrot.slane %v1692_v30, %v4377_v37  ;;  %v1707_v40 = vrot.slane %v3503_v31, %v4377_v37  ;;  %v1715_v42 = vrot.slane %v1708_v32, %v4377_v37  ;;  %v1723_v46 = vrot.slane %v3504_v33, %v4377_v37  ;;  %v4594_v62 = vpop.eup %3860 }
 0x3b4   : > { %v2274_v63 = vsel %vm1836_vm3, %v4594_v62, 0.0 }
 0x3b5   : > { %v1724_v47 = vcombine.low %v1699_v39, %v1707_v40  ;;  %v1740_v48 = vcombine.low %v1715_v42, %v1723_v46  ;;  %v1725_v49 = vcombine.high %v1699_v39, %v1707_v40  ;;  %v1741_v50 = vcombine.high %v1715_v42, %v1723_v46 }
 0x3b6   : > { %1542 = vrot.lane.b32.xlu1 %v4399_v2, %s4035_s6 }
 0x3b7   : > { %v1732_v41 = vrot.slane %v1724_v47, %v4387_v44  ;;  %v1748_v36 = vrot.slane %v1740_v48, %v4387_v44  ;;  %v1739_v34 = vrot.slane %v1725_v49, %v4387_v44  ;;  %v1755_v38 = vrot.slane %v1741_v50, %v4387_v44 }
 0x3b9   : > { %v1756_v25 = vcombine.low %v1732_v41, %v1748_v36  ;;  %v1757_v52 = vcombine.high %v1732_v41, %v1748_v36  ;;  %v1758_v35 = vcombine.low %v1739_v34, %v1755_v38  ;;  %v1759_v53 = vcombine.high %v1739_v34, %v1755_v38 }
 0x3ba   : > { %1546 = vrot.lane.b32.xlu1 %v4413_v19, %s4035_s6  ;;  %v2235_v19 = vsub.f32 %v4522_v15, %v4549_v43 }
 0x3bb   : > { %v1828_v55 = vpack.c.bf16 %v1756_v25, %v1756_v25  ;;  %v1829_v56 = vpack.c.bf16 %v1757_v52, %v1757_v52  ;;  %v1830_v26 = vpack.c.bf16 %v1758_v35, %v1758_v35  ;;  %v1831_v16 = vpack.c.bf16 %v1759_v53, %v1759_v53 }
 0x3bc   : > { %v2249_v60 = vmul.f32 1.442695, %v2235_v19 }
 0x3bd   : > { %v2314_v2 = vsel %vm2312_vm4, %v1828_v55, 0  ;;  %v2360_v45 = vsel %vm2312_vm4, %v1829_v56, 0  ;;  %v2406_v12 = vsel %vm2312_vm4, %v1830_v26, 0  ;;  %v2452_v22 = vsel %vm2312_vm4, %v1831_v16, 0 }
 0x3be   : > { %3673 = vmatpush3.bf16.msra.mxu0 %v2314_v2  ;;  %3679 = vmatpush3.bf16.msra.mxu1 %v2360_v45  ;;  %3862 = vpow2.f32 %v2249_v60 }
 0x3bf   : > { %3684 = vmatprep.subr.bf16.mxu0 %v4030_v1  ;;  %3690 = vmatprep.subr.bf16.mxu1 %v4030_v1 }
 0x3c3   : > { %1538 = vrot.lane.b32.xlu0 %v4401_v3, %s4035_s6 }
 0x3c8   : > { %v4598_v5 = vpop.eup %3862 }
 0x3c9   : > { %v2271_v3 = vsel %vm1836_vm3, %v4598_v5, 0.0 }
 0x3de   : > { %2275 = vadd.xlane.f32.xlu1 %v2274_v63 }
 0x3e2   : > { %2272 = vadd.xlane.f32.xlu0 %v2271_v3 }
 0x422   : > { %v2255_v4 = vpop.xlane.xlu1 %2254 }
 0x423   : > { %3864 = vrcp.f32 %v2255_v4 }
 0x426   : > { %v2261_v15 = vpop.xlane.xlu0 %2260 }
 0x427   : > { %3866 = vrcp.f32 %v2261_v15 }
 0x42a   : > { %v2258_v43 = vpop.xlane.xlu0 %2257 }
 0x42b   : > { %3868 = vrcp.f32 %v2258_v43 }
 0x42d   : > { %v3865_v6 = vpop.eup %3864 }
 0x42e   : > { %v2293_v7 = vmul.f32 %v3865_v6, %v4539_v51 }
 0x42f   : > { %v2267_v17 = vpop.xlane.xlu0 %2266 }
 0x430   : > { %v2301_v8 = vpack.c.bf16 %v2293_v7, %v2293_v7 }
 0x431   : > { %v3867_v9 = vpop.eup %3866 }
 0x432   : > { %v2264_v10 = vpop.xlane.xlu1 %2263  ;;  %3675 = vmatmul.mubr.msk.bf16.vlgmr.msra.gmra.mrb[12].mxu0 %vm1836_vm3, %v2301_v8  ;;  %v2295_v13 = vmul.f32 %v3867_v9, %v4543_v54 }
 0x433   : > { %3870 = vrcp.f32 %v2264_v10  ;;  %3685 = vmatpush3.bf16.msra.mxu0 %v2406_v12  ;;  %3686 = vmatprep.mubr.msk.bf16.mxu0 %vm4031_vm1, %v4030_v1 }
 0x434   : > { %3696 = vmatprep.subr.bf16.mxu0 %v4030_v1  ;;  %v2303_v21 = vpack.c.bf16 %v2295_v13, %v2295_v13  ;;  %3872 = vrcp.f32 %v2267_v17 }
 0x435   : > { %v3869_v14 = vpop.eup %3868 }
 0x436   : > { %v2294_v51 = vmul.f32 %v3869_v14, %v4547_v57  ;;  %v1543_v18 = vpop.permute.xlu1 %1542 }
 0x437   : > { %v1624_v57 = vcombine.low %v1535_v29, %v1543_v18  ;;  %v1625_v27 = vcombine.high %v1535_v29, %v1543_v18 }
 0x438   : > { %v2302_v20 = vpack.c.bf16 %v2294_v51, %v2294_v51 }
 0x439   : > { %v1632_v39 = vrot.slane %v1624_v57, %v4377_v37  ;;  %v1639_v40 = vrot.slane %v1625_v27, %v4377_v37 }
 0x43a   : > { %3681 = vmatmul.mubr.msk.bf16.vlgmr.msra.gmra.mrb[28].mxu1 %vm1836_vm3, %v2302_v20  ;;  %3687 = vmatmul.mubr.msk.bf16.vlgmr.msra.gmra.mrb[16].mxu0 %vm1836_vm3, %v2303_v21  ;;  %v2270_v23 = vpop.xlane.xlu0 %2269  ;;  %v1547_v24 = vpop.permute.xlu1 %1546 }
 0x43b   : > { %3691 = vmatpush3.bf16.msra.mxu1 %v2452_v22  ;;  %3692 = vmatprep.mubr.msk.bf16.mxu1 %vm4031_vm1, %v4030_v1  ;;  %3874 = vrcp.f32 %v2270_v23 }
 0x43c   : > { %3702 = vmatprep.subr.bf16.mxu1 %v4030_v1  ;;  %3698 = vmatprep.mubr.msk.bf16.mxu0 %vm4031_vm1, %v4030_v1 }
 0x43d   : > { %v3871_v54 = vpop.eup %3870 }
 0x43e   : > { %v2296_v28 = vmul.f32 %v3871_v54, %v4557_v0  ;;  %v1539_v30 = vpop.permute.xlu0 %1538  ;;  %v3873_v60 = vpop.eup %3872 }
 0x43f   : > { %v1640_v31 = vcombine.low %v1539_v30, %v1547_v24  ;;  %v1641_v32 = vcombine.high %v1539_v30, %v1547_v24  ;;  %v2297_v8 = vmul.f32 %v3873_v60, %v4553_v61 }
 0x440   : > { %v2304_v33 = vpack.c.bf16 %v2296_v28, %v2296_v28 }
 0x441   : > { %v1648_v42 = vrot.slane %v1640_v31, %v4377_v37  ;;  %v1655_v46 = vrot.slane %v1641_v32, %v4377_v37  ;;  %v2305_v16 = vpack.c.bf16 %v2297_v8, %v2297_v8 }
 0x442   : > { %3693 = vmatmul.mubr.msk.bf16.vlgmr.msra.gmra.mrb[32].mxu1 %vm1836_vm3, %v2304_v33 }
 0x443   : > { %v1656_v47 = vcombine.low %v1632_v39, %v1648_v42  ;;  %v1657_v48 = vcombine.high %v1632_v39, %v1648_v42  ;;  %v1672_v49 = vcombine.low %v1639_v40, %v1655_v46  ;;  %v1673_v0 = vcombine.high %v1639_v40, %v1655_v46  ;;  %3704 = vmatprep.mubr.msk.bf16.mxu1 %vm4031_vm1, %v4030_v1 }
 0x445   : > { %v1664_v50 = vrot.slane %v1656_v47, %v4387_v44  ;;  %v1671_v41 = vrot.slane %v1657_v48, %v4387_v44  ;;  %v1680_v36 = vrot.slane %v1672_v49, %v4387_v44  ;;  %v1687_v34 = vrot.slane %v1673_v0, %v4387_v44  ;;  %v3875_v15 = vpop.eup %3874 }
 0x446   : > { %v2298_v9 = vmul.f32 %v3875_v15, %v4561_v11 }
 0x447   : > { %v1760_v38 = vcombine.low %v1664_v50, %v1671_v41  ;;  %v3505_v25 = vcombine.high %v1664_v50, %v1671_v41  ;;  %v1776_v52 = vcombine.low %v1680_v36, %v1687_v34  ;;  %v3506_v35 = vcombine.high %v1680_v36, %v1687_v34 }
 0x448   : > { %v2306_v18 = vpack.c.bf16 %v2298_v9, %v2298_v9 }
 0x449   : > { %v1767_v53 = vrot.slane %v1760_v38, %v4377_v37  ;;  %v1775_v55 = vrot.slane %v3505_v25, %v4377_v37  ;;  %v1783_v56 = vrot.slane %v1776_v52, %v4377_v37  ;;  %v1791_v2 = vrot.slane %v3506_v35, %v4377_v37 }
 0x44b   : > { %v1792_v45 = vcombine.low %v1767_v53, %v1775_v55  ;;  %v1808_v58 = vcombine.low %v1783_v56, %v1791_v2  ;;  %v1793_v19 = vcombine.high %v1767_v53, %v1775_v55  ;;  %v1809_v59 = vcombine.high %v1783_v56, %v1791_v2 }
 0x44d   : > { %v1800_v63 = vrot.slane %v1792_v45, %v4387_v44  ;;  %v1816_v3 = vrot.slane %v1808_v58, %v4387_v44  ;;  %v1807_v29 = vrot.slane %v1793_v19, %v4387_v44  ;;  %v1823_v4 = vrot.slane %v1809_v59, %v4387_v44 }
 0x44f   : > { %v1824_v43 = vcombine.low %v1800_v63, %v1816_v3  ;;  %v1825_v6 = vcombine.high %v1800_v63, %v1816_v3  ;;  %v1826_v7 = vcombine.low %v1807_v29, %v1823_v4  ;;  %v1827_v26 = vcombine.high %v1807_v29, %v1823_v4 }
 0x451   : > { %v1832_v10 = vpack.c.bf16 %v1824_v43, %v1824_v43  ;;  %v1833_v12 = vpack.c.bf16 %v1825_v6, %v1825_v6  ;;  %v1834_v51 = vpack.c.bf16 %v1826_v7, %v1826_v7  ;;  %v1835_v17 = vpack.c.bf16 %v1827_v26, %v1827_v26 }
 0x453   : > { %v2498_v13 = vsel %vm2312_vm4, %v1832_v10, 0  ;;  %v2544_v14 = vsel %vm2312_vm4, %v1833_v12, 0  ;;  %v2590_v61 = vsel %vm2312_vm4, %v1834_v51, 0  ;;  %v2636_v11 = vsel %vm2312_vm4, %v1835_v17, 0 }
 0x454   : > { %3697 = vmatpush3.bf16.msra.mxu0 %v2498_v13  ;;  %3703 = vmatpush3.bf16.msra.mxu1 %v2544_v14 }
 0x455   : > { %3708 = vmatprep.subr.bf16.mxu0 %v4030_v1  ;;  %3714 = vmatprep.subr.bf16.mxu1 %v4030_v1 }
 0x457   : > { %3699 = vmatmul.mubr.msk.bf16.vlgmr.msra.gmra.mrb[20].mxu0 %vm1836_vm3, %v2305_v16  ;;  %3705 = vmatmul.mubr.msk.bf16.vlgmr.msra.gmra.mrb[36].mxu1 %vm1836_vm3, %v2306_v18 }
 0x458   : > { %3709 = vmatpush3.bf16.msra.mxu0 %v2590_v61  ;;  %3715 = vmatpush3.bf16.msra.mxu1 %v2636_v11 }
 0x459   : > { %3716 = vmatprep.mubr.msk.bf16.mxu1 %vm4031_vm1, %v4030_v1  ;;  %3710 = vmatprep.mubr.msk.bf16.mxu0 %vm4031_vm1, %v4030_v1 }
 0x45a   : > { %3720 = vmatprep.subr.bf16.mxu0 %v4030_v1  ;;  %3728 = vmatprep.subr.bf16.mxu1 %v4030_v1 }
 0x46b   : > { %v2276_v20 = vpop.xlane.xlu1 %2275 }
 0x46c   : > { %3876 = vrcp.f32 %v2276_v20 }
 0x46f   : > { %v2273_v21 = vpop.xlane.xlu0 %2272 }
 0x470   : > { %3878 = vrcp.f32 %v2273_v21 }
 0x476   : > { %v3877_v22 = vpop.eup %3876 }
 0x477   : > { %v2300_v23 = vmul.f32 %v3877_v22, %v4594_v62 }
 0x479   : > { %v2308_v54 = vpack.c.bf16 %v2300_v23, %v2300_v23 }
 0x47a   : > { %v3879_v57 = vpop.eup %3878 }
 0x47b   : > { %v2299_v27 = vmul.f32 %v3879_v57, %v4598_v5  ;;  %3717 = vmatmul.mubr.msk.bf16.vlgmr.msra.gmra.mrb[40].mxu1 %vm1836_vm3, %v2308_v54 }
 0x47c   : > { %3732 = vmatprep.mubr.msk.bf16.mxu1 %vm4031_vm1, %v4030_v1 }
 0x47d   : > { %v2307_v28 = vpack.c.bf16 %v2299_v27, %v2299_v27 }
 0x47f   : > { %3711 = vmatmul.mubr.msk.bf16.vlgmr.msra.gmra.mrb[24].mxu0 %vm1836_vm3, %v2307_v28 }
 0x480   : > { %3724 = vmatprep.mubr.msk.bf16.mxu0 %vm4031_vm1, %v4030_v1 }
 0x505   : > { %v2350_v24 = vpop.f32.mrb[12].mxu0 }
 0x506   : > { %v3676_v30 = vpop.f32.mrb[13].mxu0 }
 0x507   : > { %v2353_v31 = vpop.f32.mrb[14].mxu0 }
 0x508   : > { %v3677_v32 = vpop.f32.mrb[15].mxu0 }
 0x50d   : > { %v2396_v62 = vpop.f32.mrb[28].mxu1  ;;  %v2442_v33 = vpop.f32.mrb[16].mxu0 }
 0x50e   : > { %v2678_v39 = vcombine.low %v2350_v24, %v2442_v33  ;;  %v2679_v40 = vcombine.high %v2350_v24, %v2442_v33  ;;  %v3682_v5 = vpop.f32.mrb[29].mxu1  ;;  %v3688_v42 = vpop.f32.mrb[17].mxu0 }
 0x50f   : > { %v2399_v46 = vpop.f32.mrb[30].mxu1  ;;  %v2445_v47 = vpop.f32.mrb[18].mxu0 }
 0x510   : > { %v3683_v48 = vpop.f32.mrb[31].mxu1  ;;  %v3689_v49 = vpop.f32.mrb[19].mxu0  ;;  %v2686_v38 = vrot.slane %v2678_v39, %v4377_v37  ;;  %v2693_v25 = vrot.slane %v2679_v40, %v4377_v37 }
 0x515   : > { %v2488_v0 = vpop.f32.mrb[32].mxu1 }
 0x516   : > { %v2694_v50 = vcombine.low %v2396_v62, %v2488_v0  ;;  %v2695_v41 = vcombine.high %v2396_v62, %v2488_v0  ;;  %v3694_v36 = vpop.f32.mrb[33].mxu1 }
 0x517   : > { %v2491_v34 = vpop.f32.mrb[34].mxu1 }
 0x518   : > { %v2702_v52 = vrot.slane %v2694_v50, %v4377_v37  ;;  %v2709_v35 = vrot.slane %v2695_v41, %v4377_v37  ;;  %v3695_v53 = vpop.f32.mrb[35].mxu1 }
 0x51a   : > { %v2710_v55 = vcombine.low %v2686_v38, %v2702_v52  ;;  %v2711_v56 = vcombine.high %v2686_v38, %v2702_v52  ;;  %v2726_v2 = vcombine.low %v2693_v25, %v2709_v35  ;;  %v2727_v45 = vcombine.high %v2693_v25, %v2709_v35 }
 0x51c   : > { %v2718_v58 = vrot.slane %v2710_v55, %v4387_v44  ;;  %v2725_v19 = vrot.slane %v2711_v56, %v4387_v44  ;;  %v2734_v59 = vrot.slane %v2726_v2, %v4387_v44  ;;  %v2741_v60 = vrot.slane %v2727_v45, %v4387_v44  ;;  %v3836_v45 = vld [vmem:[%s4269_s1] sm:$0xff]  }
 0x51d   : > { %3721 = vmatpush3.bf16.msra.mxu0 %v3836_v45 }
 0x51e   : > { %v2814_v63 = vcombine.low %v2718_v58, %v2725_v19  ;;  %v3523_v3 = vcombine.high %v2718_v58, %v2725_v19  ;;  %v2830_v29 = vcombine.low %v2734_v59, %v2741_v60  ;;  %v3524_v4 = vcombine.high %v2734_v59, %v2741_v60  ;;  %3722 = vmatprep.subr.bf16.mxu0 %v4030_v1 }
 0x520   : > { %v2821_v15 = vrot.slane %v2814_v63, %v4377_v37  ;;  %v2829_v43 = vrot.slane %v3523_v3, %v4377_v37  ;;  %v2837_v6 = vrot.slane %v2830_v29, %v4377_v37  ;;  %v2845_v7 = vrot.slane %v3524_v4, %v4377_v37 }
 0x522   : > { %v2847_v26 = vcombine.high %v2821_v15, %v2829_v43  ;;  %v2863_v8 = vcombine.high %v2837_v6, %v2845_v7  ;;  %v2846_v9 = vcombine.low %v2821_v15, %v2829_v43  ;;  %v2862_v10 = vcombine.low %v2837_v6, %v2845_v7 }
 0x524   : > { %v4675_v12 = vrot.slane %v2847_v26, %v4387_v44  ;;  %v4678_v13 = vrot.slane %v2863_v8, %v4387_v44  ;;  %v4681_v14 = vrot.slane %v2846_v9, %v4387_v44  ;;  %v4684_v51 = vrot.slane %v2862_v10, %v4387_v44  ;;  %v3837_v26 = vld [vmem:[%s4269_s1 + $0x8] sm:$0xff]  }
 0x525   : > { %3723 = vmatpush3.bf16.msra.mxu0 %v3837_v26 }
 0x526   : > { %v2880_v17 = vcombine.low %v4675_v12, %v4678_v13  ;;  %v2878_v16 = vcombine.low %v4681_v14, %v4684_v51  ;;  %v2879_v18 = vcombine.high %v4681_v14, %v4684_v51  ;;  %v2881_v61 = vcombine.high %v4675_v12, %v4678_v13  ;;  %3736 = vmatprep.subr.bf16.mxu0 %v4030_v1  ;;  %v3838_v14 = vld [vmem:[%s4278_s3] sm:$0xff]   ;;  %v3839_v51 = vld [vmem:[%s4278_s3 + $0x8] sm:$0xff]  }
 0x527   : > { %3729 = vmatpush3.bf16.msra.mxu1 %v3838_v14 }
 0x528   : > { %3730 = vmatprep.subr.bf16.mxu1 %v4030_v1 }
 0x52a   : > { %v2534_v11 = vpop.f32.mrb[20].mxu0  ;;  %v2580_v20 = vpop.f32.mrb[36].mxu1 }
 0x52b   : > { %v3700_v21 = vpop.f32.mrb[21].mxu0  ;;  %v3706_v22 = vpop.f32.mrb[37].mxu1  ;;  %3731 = vmatpush3.bf16.msra.mxu1 %v3839_v51 }
 0x52c   : > { %v2537_v23 = vpop.f32.mrb[22].mxu0  ;;  %v2583_v54 = vpop.f32.mrb[38].mxu1 }
 0x52d   : > { %v3701_v57 = vpop.f32.mrb[23].mxu0  ;;  %v3707_v27 = vpop.f32.mrb[39].mxu1 }
 0x54e   : > { %v2672_v28 = vpop.f32.mrb[40].mxu1 }
 0x54f   : > { %v2762_v24 = vcombine.low %v2580_v20, %v2672_v28  ;;  %v2763_v30 = vcombine.high %v2580_v20, %v2672_v28  ;;  %v3718_v31 = vpop.f32.mrb[41].mxu1 }
 0x550   : > { %v2675_v32 = vpop.f32.mrb[42].mxu1 }
 0x551   : > { %v3719_v62 = vpop.f32.mrb[43].mxu1  ;;  %v2770_v46 = vrot.slane %v2762_v24, %v4377_v37  ;;  %v2777_v47 = vrot.slane %v2763_v30, %v4377_v37 }
 0x552   : > { %v2626_v33 = vpop.f32.mrb[24].mxu0  ;;  %v3841_v62 = vld [vmem:[%s4288_s2 + $0x8] sm:$0xff]  }
 0x553   : > { %v2746_v39 = vcombine.low %v2534_v11, %v2626_v33  ;;  %v2747_v40 = vcombine.high %v2534_v11, %v2626_v33  ;;  %v3712_v5 = vpop.f32.mrb[25].mxu0  ;;  %v3842_v33 = vld [vmem:[%s4288_s2 + $0x10] sm:$0xff]  }
 0x554   : > { %v2629_v42 = vpop.f32.mrb[26].mxu0  ;;  %v3845_v5 = vld [vmem:[%s4288_s2 + $0x28] sm:$0xff]  }
 0x555   : > { %v2754_v48 = vrot.slane %v2746_v39, %v4377_v37  ;;  %v2761_v49 = vrot.slane %v2747_v40, %v4377_v37  ;;  %v3713_v0 = vpop.f32.mrb[27].mxu0  ;;  %v3843_v39 = vld [vmem:[%s4288_s2 + $0x18] sm:$0xff]   ;;  %v3844_v40 = vld [vmem:[%s4288_s2 + $0x20] sm:$0xff]  }
 0x556   : > { %v3527_v42 = vld [vmem:[%s4836_s23] ss:$0 sm:$0xff] }
 0x557   : > { %v2778_v50 = vcombine.low %v2754_v48, %v2770_v46  ;;  %v2779_v41 = vcombine.high %v2754_v48, %v2770_v46  ;;  %v2794_v36 = vcombine.low %v2761_v49, %v2777_v47  ;;  %v2795_v34 = vcombine.high %v2761_v49, %v2777_v47 }
 0x559   : > { %v2786_v38 = vrot.slane %v2778_v50, %v4387_v44  ;;  %v2793_v25 = vrot.slane %v2779_v41, %v4387_v44  ;;  %v2802_v52 = vrot.slane %v2794_v36, %v4387_v44  ;;  %v2809_v35 = vrot.slane %v2795_v34, %v4387_v44  ;;  %v3880_v41 = vld [vmem:[#allocation2] sm:$0xff]  ;;  %v3881_v34 = vld [vmem:[#allocation2 + $0x8] sm:$0xff] }
 0x55b   : > { %v2882_v53 = vcombine.low %v2786_v38, %v2793_v25  ;;  %v3525_v55 = vcombine.high %v2786_v38, %v2793_v25  ;;  %v2898_v56 = vcombine.low %v2802_v52, %v2809_v35  ;;  %v3526_v2 = vcombine.high %v2802_v52, %v2809_v35  ;;  %v3846_v52 = vld [vmem:[%s4288_s2 + $0x30] sm:$0xff]   ;;  %v3847_v35 = vld [vmem:[%s4288_s2 + $0x38] sm:$0xff]  }
 0x55d   : > { %v2889_v58 = vrot.slane %v2882_v53, %v4377_v37  ;;  %v2897_v19 = vrot.slane %v3525_v55, %v4377_v37  ;;  %v2905_v59 = vrot.slane %v2898_v56, %v4377_v37  ;;  %v2913_v60 = vrot.slane %v3526_v2, %v4377_v37  ;;  %v3531_v53 = vld [vmem:[%s4837_s26] ss:$0 sm:$0xff] }
 0x55f   : > { %v2915_v63 = vcombine.high %v2889_v58, %v2897_v19  ;;  %v2931_v3 = vcombine.high %v2905_v59, %v2913_v60  ;;  %v2914_v29 = vcombine.low %v2889_v58, %v2897_v19  ;;  %v2930_v4 = vcombine.low %v2905_v59, %v2913_v60 }
 0x561   : > { %v2929_v15 = vrot.slane %v2915_v63, %v4387_v44  ;;  %v2945_v43 = vrot.slane %v2931_v3, %v4387_v44  ;;  %v2922_v6 = vrot.slane %v2914_v29, %v4387_v44  ;;  %v2938_v7 = vrot.slane %v2930_v4, %v4387_v44 }
 0x563   : > { %v2948_v8 = vcombine.low %v2929_v15, %v2945_v43  ;;  %v2947_v9 = vcombine.high %v2922_v6, %v2938_v7  ;;  %v2946_v10 = vcombine.low %v2922_v6, %v2938_v7  ;;  %v2949_v37 = vcombine.high %v2929_v15, %v2945_v43  ;;  %v3237_v15 = vld [vmem:[%s4297_s22] sm:$0xff] }
 0x565   : > { %v3822_v12 = vpack.i.bf16 %v2948_v8, %v2880_v17  ;;  %v3817_v13 = vpack.i.bf16 %v2947_v9, %v2879_v18  ;;  %v3827_v11 = vpack.i.bf16 %v2949_v37, %v2881_v61  ;;  %v3238_v8 = vld [vmem:[%s4297_s22 + $0x8] sm:$0xff] }
 0x567   : > { %3823 = vrot.lane.b32.xlu1 %v3822_v12, %s4038_s30  ;;  %3818 = vrot.lane.b32.xlu0 %v3817_v13, %s4039_s0 }
 0x56b   : > { %3828 = vrot.lane.b32.xlu0 %v3827_v11, %s4040_s28 }
 0x5d9   : > { %v3824_v20 = vpop.permute.xlu1 %3823  ;;  %v3819_v44 = vpop.permute.xlu0 %3818 }
 0x5da   : > { %v3821_v21 = vunpack.i.h.bf16 %v3819_v44  ;;  %v3820_v22 = vunpack.i.l.bf16 %v3819_v44  ;;  %v3826_v23 = vunpack.i.h.bf16 %v3824_v20  ;;  %v3825_v54 = vunpack.i.l.bf16 %v3824_v20 }
 0x5dc   : > { %v2974_v17 = vsel %vm1836_vm3, %v2878_v16, %v3820_v22  ;;  %v2975_v18 = vsel %vm1836_vm3, %v2946_v10, %v3821_v21  ;;  %v3840_v16 = vld [vmem:[%s4288_s2] sm:$0xff]  }
 0x5dd   : > { %v3829_v61 = vpop.permute.xlu0 %3828  ;;  %v2977_v28 = vsel %vm2976_vm5, %v2974_v17, %v3825_v54  ;;  %v2978_v24 = vsel %vm2976_vm5, %v2975_v18, %v3826_v23 }
 0x5de   : > { %v3831_v57 = vunpack.i.h.bf16 %v3829_v61  ;;  %v3830_v27 = vunpack.i.l.bf16 %v3829_v61 }
 0x5e0   : > { %v2980_v30 = vsel %vm2979_vm6, %v2977_v28, %v3830_v27  ;;  %v2981_v31 = vsel %vm2979_vm6, %v2978_v24, %v3831_v57 }
 0x5e1   : > { %v2986_v32 = vpack.c.bf16 %v2981_v31, %v2980_v30 }
 0x5e3   : > { %3725 = vmatmul.mubr.msk.bf16.vlgmr.msra.gmra.mrb[28].mxu0 %vm817_vm2, %v2986_v32 }
 0x5e4   : > { %3752 = vmatprep.mubr.msk.bf16.mxu0 %vm4031_vm1, %v4030_v1  ;;  %3737 = vmatpush3.bf16.msra.mxu0 %v3840_v16 }
 0x5e5   : > { %3738 = vmatprep.subr.bf16.mxu0 %v4030_v1 }
 0x5e8   : > { %3739 = vmatpush3.bf16.msra.mxu0 %v3841_v62 }
 0x5e9   : > { %3740 = vmatprep.subr.bf16.mxu0 %v4030_v1 }
 0x5ec   : > { %3741 = vmatpush3.bf16.msra.mxu0 %v3842_v33 }
 0x5ed   : > { %3742 = vmatprep.subr.bf16.mxu0 %v4030_v1 }
 0x5f0   : > { %3743 = vmatpush3.bf16.msra.mxu0 %v3843_v39 }
 0x5f1   : > { %3744 = vmatprep.subr.bf16.mxu0 %v4030_v1 }
 0x5f4   : > { %3745 = vmatpush3.bf16.msra.mxu0 %v3844_v40 }
 0x5f5   : > { %3746 = vmatprep.subr.bf16.mxu0 %v4030_v1 }
 0x5f8   : > { %3747 = vmatpush3.bf16.msra.mxu0 %v3845_v5 }
 0x5f9   : > { %3748 = vmatprep.subr.bf16.mxu0 %v4030_v1 }
 0x5fc   : > { %3749 = vmatpush3.bf16.msra.mxu0 %v3846_v52 }
 0x5fd   : > { %3750 = vmatprep.subr.bf16.mxu0 %v4030_v1  ;;  %v3535_v1 = vld [vmem:[%s4838_s17] ss:$0 sm:$0xff] }
 0x600   : > { %3751 = vmatpush3.bf16.msra.mxu0 %v3847_v35 }
 0x6b6   : > { %v3043_v46 = vpop.f32.mrb[28].mxu0 }
 0x6b7   : > { %v3044_v47 = vadd.f32 %v3527_v42, %v3043_v46  ;;  %v3726_v48 = vpop.f32.mrb[29].mxu0 }
 0x6b8   : > { %v3046_v49 = vpop.f32.mrb[30].mxu0 }
 0x6b9   : > { %v3047_v0 = vadd.f32 %v3527_v42, %v3046_v49  ;;  %v3727_v50 = vpop.f32.mrb[31].mxu0  ;;  %v3050_v36 = vadd.f32 %v3880_v41, %v3044_v47 }
 0x6bb   : > { %v3051_v38 = vadd.f32 %v3881_v34, %v3047_v0 }
 0x6bd   : > { %v3056_v25 = vpack.c.bf16 %v3051_v38, %v3050_v36 }
 0x6bf   : > { %3733 = vmatmul.mubr.msk.bf16.vlgmr.msra.gmra.mrb[44].mxu1 %vm817_vm2, %v3056_v25 }
 0x792   : > { %v3113_v55 = vpop.f32.mrb[44].mxu1 }
 0x793   : > { %v3114_v56 = vadd.f32 %v3531_v53, %v3113_v55  ;;  %v3734_v2 = vpop.f32.mrb[45].mxu1 }
 0x794   : > { %v3116_v45 = vpop.f32.mrb[46].mxu1 }
 0x795   : > { %v3117_v58 = vadd.f32 %v3531_v53, %v3116_v45  ;;  %v3735_v19 = vpop.f32.mrb[47].mxu1  ;;  %v3120_v59 = vmax.f32 %v3114_v56, 0.0 }
 0x797   : > { %v3121_v60 = vmax.f32 %v3117_v58, 0.0 }
 0x799   : > { %v3138_v63 = vpack.c.bf16 %v3121_v60, %v3120_v59 }
 0x79b   : > { %3753 = vmatmul.mubr.bf16.vlgmr.msra.gmra.mrb[32].mxu0 %v3138_v63 }
 0x86e   : > { %v3228_v3 = vpop.f32.mrb[32].mxu0 }
 0x86f   : > { %v3229_v29 = vadd.f32 %v3535_v1, %v3228_v3  ;;  %v3754_v4 = vpop.f32.mrb[33].mxu0 }
 0x870   : > { %v3231_v43 = vpop.f32.mrb[34].mxu0 }
 0x871   : > { %v3235_v6 = vadd.f32 %v3229_v29, %v3050_v36  ;;  %v3232_v7 = vadd.f32 %v3535_v1, %v3231_v43  ;;  %v3755_v26 = vpop.f32.mrb[35].mxu0  ;;  %3246 = sbr.rel (%p3544_p13) target bundleno = 2168 (0x878), region = 96 }
 0x873   : > { %v3239_v9 = vadd.f32 %v3237_v15, %v3235_v6  ;;  %v3236_v10 = vadd.f32 %v3232_v7, %v3051_v38 }
 0x875   : > { %3241 = vst.msk [vmem:[#allocation2] sm:$0xff] %vm817_vm2, %v3239_v9  ;;  %v3240_v37 = vadd.f32 %v3238_v8, %v3236_v10  ;;  %3247 = vst.msk [vmem:[#allocation11] sm:$0xff] (!%p3544_p13), %vm817_vm2, %v3239_v9 }
 0x877   : > { %3242 = vst.msk [vmem:[#allocation2 + $0x8] sm:$0xff] %vm817_vm2, %v3240_v37  ;;  %3248 = vst.msk [vmem:[#allocation11 + $0x8] sm:$0xff] (!%p3544_p13), %vm817_vm2, %v3240_v37 }
 0x878 PF: > { %p3788_p0 = scmp.eq.s32.totalorder %s4141_s16, 1  ;;  %s4041_s19 = smov [#allocation11]  }
 0x879   : > { %s3255_s22 = sshll.u32 %s4041_s19, 4  ;;  %s3256_s22 = int_to_ptr.vmem [resolvable:$true] %s3255_s22 }
 0x87a   : > { %s3976_s4 = scalar_lea.vmem %s3256_s22, 256  ;;  %p3983_p4 = scmp.lt.s32.totalorder %s3256_s22, %s3256_s22 }
 0x87b   : > { %p3977_p1 = scmp.ne.s32.totalorder %s3256_s22, %s3976_s4  ;;  %p3984_p8 = scmp.lt.s32.totalorder %s3976_s4, %s3976_s4 }
 0x87d   : > { %p3978_p2 = pnand %p3977_p1, %p3788_p0  ;;  %p3985_p10 = por %p3984_p8, %p3983_p4 }
 0x87f   : > { %p3979_p3 = pneg %p3978_p2 }
 0x881   : > { %p3986_p12 = pnand %p3985_p10, %p3979_p3 }
 0x883   : > { %3989 = shalt.err (!%p3986_p12)
}
 0x884   : > { %s3990_s21 = scalar_lea.hbm %s4806_s15, 256 }
 0x885   : > { %p3991_p11 = scmp.ne.s32.totalorder %s4806_s15, %s3990_s21  ;;  %p3996_p7 = scmp.lt.u32.totalorder %s3990_s21, %s4806_s15 }
 0x887   : > { %p3992_p5 = pnand %p3991_p11, %p3788_p0 }
 0x889   : > { %p3993_p6 = pneg %p3992_p5 }
 0x88b   : > { %p3998_p9 = pnand %p3996_p7, %p3993_p6 }
 0x88d   : > { %4001 = shalt.err (!%p3998_p9)
}
 0x88e   : > { %s4042_s30 = smov 128  }
 0x88f   : > { %3769 = dma.vmem_to_hbm [thread:$0]  (%p3788_p0), %s3256_s22, 256, %s4806_s15, [#allocation7], %s4042_s30, %s4042_s30, %s4039_s0  }
 0x890   : > { %4017 = dma.done.wait (%p3788_p0), [#allocation7], 256  }
 0x891   : > { %4019 = vsyncadd (%p3788_p0), [#allocation7], 4294967040 }
 0x892 PF: > { %s4839_s3 = sld [smem:[#allocation16_spill]] }
 0x898   : > { %s32_s28 = sadd.s32 1, %s4839_s3  }
 0x899   : > { %p29_p13 = scmp.ge.s32.totalorder %s32_s28, 4  }
 0x89b   :  { %31 = sbr.rel (!%p29_p13) target bundleno = 17 (0x11), region = 170 }
 0x8a2   :  { %3271 = vsyncpa [#allocation6], 1 }
 0x8a3   :  { %3273 = vsyncpa [#allocation6 + $0x1], 1 }
 0x8a4   :  { %3274 = vsyncpa [#allocation9], 1 }
 0x8a5   :  { %3275 = vsyncpa [#allocation7], 1 }
 0x8a6   :  { %3277 = vsyncpa [#allocation7 + $0x1], 1 }

</bundles_post_ra>
